<compile_context>
chip_gen: v6e
topology: v6e:2x2x1
jax: 0.10.0
libtpu: 0.0.40
codegen_flags: <defaults>
</compile_context>

<pallas_src>
import functools

import jax
import jax.numpy as jnp
from jax.experimental import pallas as pl
from jax.experimental.pallas import tpu as pltpu

LANE = 128
SUBLANE_BF16 = 16  # bf16 packs 16 rows per sublane group


def _round_up(x, m):
    return ((x + m - 1) // m) * m


def mlp_kernel(x_ref, w1_ref, b1_ref, w2_ref, b2_ref, w3_ref, b3_ref, o_ref):
    # fc1 + ReLU (bf16 operands, f32 accumulate on MXU); cast back to bf16 as
    # part of the ReLU to halve VMEM spill of the (tb, 1024) intermediate.
    h1 = jnp.dot(x_ref[...], w1_ref[...], preferred_element_type=jnp.float32)
    h1 = jnp.maximum(h1 + b1_ref[...], 0.0).astype(jnp.bfloat16)
    # fc2 + ReLU
    h2 = jnp.dot(h1, w2_ref[...], preferred_element_type=jnp.float32)
    h2 = jnp.maximum(h2 + b2_ref[...], 0.0).astype(jnp.bfloat16)
    # fc3 (logits, lane-dense padded to 128 columns; no activation)
    o_ref[...] = (
        jnp.dot(h2, w3_ref[...], preferred_element_type=jnp.float32) + b3_ref[...]
    )


def prepare_params(w1, b1, w2, b2, w3, b3):
    """One-time (init-time) weight prep, hoisted out of the forward path.

    Returns ((w1p, b1, w2b, b2, w3p, b3p), out_dim):
      * all weights cast to bf16 (weight/activation streaming, f32 MXU acc)
      * w1 rows zero-padded so the input feature dim is a multiple of 128
      * w3 / b3 columns zero-padded 2 -> 128 so the final store is lane-dense
    """
    in_dim, h1_dim = w1.shape
    h2_dim, out_dim = w3.shape
    dim_p = _round_up(in_dim, LANE)
    n_pad = _round_up(max(out_dim, LANE), LANE)

    w1p = (
        jnp.zeros((dim_p, h1_dim), jnp.bfloat16)
        .at[:in_dim, :]
        .set(w1.astype(jnp.bfloat16))
    )
    w2b = w2.astype(jnp.bfloat16)
    w3p = (
        jnp.zeros((h2_dim, n_pad), jnp.bfloat16)
        .at[:, :out_dim]
        .set(w3.astype(jnp.bfloat16))
    )
    b1p = b1.reshape(1, h1_dim).astype(jnp.float32)
    b2p = b2.reshape(1, h2_dim).astype(jnp.float32)
    b3p = jnp.zeros((1, n_pad), jnp.float32).at[:, :out_dim].set(b3.reshape(1, -1))
    return (w1p, b1p, w2b, b2p, w3p, b3p), out_dim


def _choose_tiling(B, tile_b):
    """Batch tiling: 16-row granularity, tight padding, and >=2 grid steps
    whenever the batch allows so v7x's two TensorCores both get work."""
    Bp16 = _round_up(max(B, SUBLANE_BF16), SUBLANE_BF16)
    g = max(1, -(-Bp16 // tile_b))           # ceil-div
    if g == 1 and Bp16 >= 2 * SUBLANE_BF16:  # split a lone tile across 2 TCs
        g = 2
    tb = _round_up(-(-Bp16 // g), SUBLANE_BF16)
    return tb, g * tb, g


@functools.partial(jax.jit, static_argnames=("out_dim", "tile_b"))
def three_layer_classifier(x, w1p, b1, w2b, b2, w3p, b3p, *, out_dim, tile_b=512):
    """x: (B, dim) f32.  Remaining args come from prepare_params()."""
    B, dim = x.shape
    dim_p, h1_dim = w1p.shape
    h2_dim, n_pad = w3p.shape

    tb, Bp, g = _choose_tiling(B, tile_b)

    # Lane-dense bf16 input: pad features to dim_p (multiple of 128), batch to Bp.
    xb = jnp.pad(x.astype(jnp.bfloat16), ((0, Bp - B), (0, dim_p - dim)))

    x_spec = pl.BlockSpec((tb, dim_p), lambda i: (i, 0))
    out_spec = pl.BlockSpec((tb, n_pad), lambda i: (i, 0))
    # Weights / biases: constant block index -> DMA'd once, stay VMEM-resident
    # (Pallas skips the re-fetch when the block index is unchanged).  Single
    # buffering them (pl.Buffered(1)) would shave ~1.2 MiB more VMEM but is
    # unnecessary within the 32 MiB budget at these sizes.
    const = lambda shape: pl.BlockSpec(shape, lambda i: (0, 0))

    flops = 2 * Bp * (dim_p * h1_dim + h1_dim * h2_dim + h2_dim * n_pad)
    bytes_accessed = (
        2 * (w1p.size + w2b.size + w3p.size + Bp * dim_p)   # bf16 streams
        + 4 * (b1.size + b2.size + b3p.size + Bp * n_pad)   # f32 biases + out
    )

    out = pl.pallas_call(
        mlp_kernel,
        out_shape=jax.ShapeDtypeStruct((Bp, n_pad), jnp.float32),
        grid=(g,),
        in_specs=[
            x_spec,
            const(w1p.shape),
            const(b1.shape),
            const(w2b.shape),
            const(b2.shape),
            const(w3p.shape),
            const(b3p.shape),
        ],
        out_specs=out_spec,
        compiler_params=pltpu.CompilerParams(
            dimension_semantics=("parallel",),
            vmem_limit_bytes=32 << 20,   # also fits v7x's 64 MiB physical VMEM
        ),
        cost_estimate=pl.CostEstimate(
            flops=flops, transcendentals=0, bytes_accessed=bytes_accessed
        ),
    )(xb, w1p, b1, w2b, b2, w3p, b3p)

    return out[:B, :out_dim]


def init_linear(key, in_features, out_features):
    """PyTorch-style init U(-1/sqrt(in), 1/sqrt(in)); W as (in,out), b as (1,out)."""
    kw, kb = jax.random.split(key)
    bound = 1.0 / jnp.sqrt(jnp.float32(in_features))
    w = jax.random.uniform(
        kw, (in_features, out_features), jnp.float32, -bound, bound
    )
    b = jax.random.uniform(kb, (1, out_features), jnp.float32, -bound, bound)
    return w, b


def reference_forward(x, w1, b1, w2, b2, w3, b3):
    h1 = jnp.maximum(x @ w1 + b1, 0.0)
    h2 = jnp.maximum(h1 @ w2 + b2, 0.0)
    return h2 @ w3 + b3


if __name__ == "__main__":
    key = jax.random.PRNGKey(0)
    k_x, k1, k2, k3 = jax.random.split(key, 4)

    batch = 8
    dim = 32  # input feature dim of the classifier

    x = jax.random.normal(k_x, (batch, dim), jnp.float32)
    w1, b1 = init_linear(k1, dim, 1024)
    w2, b2 = init_linear(k2, 1024, 512)
    w3, b3 = init_linear(k3, 512, 2)

    # Weight prep happens ONCE here, outside the per-call forward path.
    params, out_dim = prepare_params(w1, b1, w2, b2, w3, b3)
    params = jax.block_until_ready(params)

    out = three_layer_classifier(x, *params, out_dim=out_dim)
    out = jax.block_until_ready(out)

    ref = reference_forward(x, w1, b1, w2, b2, w3, b3)
    assert out.shape == (batch, 2)
    # bf16 streaming (f32 accumulation) vs pure-f32 reference: loosened tolerance.
    assert jnp.allclose(out, ref, atol=2e-2, rtol=2e-2), (
        float(jnp.max(jnp.abs(out - ref)))
    )

    print("KERNEL_OK")
</pallas_src>

<mosaic_0001>
module attributes {stable_mosaic.version = 11 : i64} {
  func.func @mlp_kernel(%arg0: i32, %arg1: memref<16x128xbf16, #tpu.memory_space<vmem>>, %arg2: memref<128x1024xbf16, #tpu.memory_space<vmem>>, %arg3: memref<1x1024xf32, #tpu.memory_space<vmem>>, %arg4: memref<1024x512xbf16, #tpu.memory_space<vmem>>, %arg5: memref<1x512xf32, #tpu.memory_space<vmem>>, %arg6: memref<512x128xbf16, #tpu.memory_space<vmem>>, %arg7: memref<1x128xf32, #tpu.memory_space<vmem>>, %arg8: memref<16x128xf32, #tpu.memory_space<vmem>>) attributes {dimension_semantics = [#tpu.dimension_semantics<parallel>], iteration_bounds = array<i64: 1>, scalar_prefetch = 0 : i64, scratch_operands = 0 : i64, tpu.core_type = #tpu.core_type<tc>, window_params = [{transform_indices = @transform_0, window_bounds = array<i64: 16, 128>}, {pipeline_mode = #tpu.pipeline_mode<synchronous>, transform_indices = @transform_1, window_bounds = array<i64: 128, 1024>}, {pipeline_mode = #tpu.pipeline_mode<synchronous>, transform_indices = @transform_2, window_bounds = array<i64: 1, 1024>}, {pipeline_mode = #tpu.pipeline_mode<synchronous>, transform_indices = @transform_3, window_bounds = array<i64: 1024, 512>}, {pipeline_mode = #tpu.pipeline_mode<synchronous>, transform_indices = @transform_4, window_bounds = array<i64: 1, 512>}, {pipeline_mode = #tpu.pipeline_mode<synchronous>, transform_indices = @transform_5, window_bounds = array<i64: 512, 128>}, {pipeline_mode = #tpu.pipeline_mode<synchronous>, transform_indices = @transform_6, window_bounds = array<i64: 1, 128>}, {transform_indices = @transform_7, window_bounds = array<i64: 16, 128>}]} {
    %c0 = arith.constant 0 : index
    %c0_0 = arith.constant 0 : index
    %0 = vector.load %arg1[%c0, %c0_0] : memref<16x128xbf16, #tpu.memory_space<vmem>>, vector<16x128xbf16>
    %c0_1 = arith.constant 0 : index
    %c0_2 = arith.constant 0 : index
    %1 = vector.load %arg2[%c0_1, %c0_2] : memref<128x1024xbf16, #tpu.memory_space<vmem>>, vector<128x1024xbf16>
    %cst = arith.constant dense<0.000000e+00> : vector<16x1024xf32>
    %2 = tpu.matmul %0, %1, %cst {dimension_numbers = #tpu.dot_dimension_numbers<[1], [0], [0], [1], [0, 0, 1, 1], [], []>} : vector<16x128xbf16>, vector<128x1024xbf16>, vector<16x1024xf32> -> vector<16x1024xf32>
    %c0_3 = arith.constant 0 : index
    %c0_4 = arith.constant 0 : index
    %3 = vector.load %arg3[%c0_3, %c0_4] : memref<1x1024xf32, #tpu.memory_space<vmem>>, vector<1x1024xf32>
    %4 = vector.broadcast %3 : vector<1x1024xf32> to vector<16x1024xf32>
    %5 = arith.addf %2, %4 : vector<16x1024xf32>
    %cst_5 = arith.constant 0.000000e+00 : f32
    %6 = vector.broadcast %cst_5 : f32 to vector<16x1024xf32>
    %7 = arith.maximumf %5, %6 : vector<16x1024xf32>
    %8 = arith.truncf %7 : vector<16x1024xf32> to vector<16x1024xbf16>
    %c0_6 = arith.constant 0 : index
    %c0_7 = arith.constant 0 : index
    %9 = vector.load %arg4[%c0_6, %c0_7] : memref<1024x512xbf16, #tpu.memory_space<vmem>>, vector<1024x512xbf16>
    %cst_8 = arith.constant dense<0.000000e+00> : vector<16x512xf32>
    %10 = tpu.matmul %8, %9, %cst_8 {dimension_numbers = #tpu.dot_dimension_numbers<[1], [0], [0], [1], [0, 0, 1, 1], [], []>} : vector<16x1024xbf16>, vector<1024x512xbf16>, vector<16x512xf32> -> vector<16x512xf32>
    %c0_9 = arith.constant 0 : index
    %c0_10 = arith.constant 0 : index
    %11 = vector.load %arg5[%c0_9, %c0_10] : memref<1x512xf32, #tpu.memory_space<vmem>>, vector<1x512xf32>
    %12 = vector.broadcast %11 : vector<1x512xf32> to vector<16x512xf32>
    %13 = arith.addf %10, %12 : vector<16x512xf32>
    %cst_11 = arith.constant 0.000000e+00 : f32
    %14 = vector.broadcast %cst_11 : f32 to vector<16x512xf32>
    %15 = arith.maximumf %13, %14 : vector<16x512xf32>
    %16 = arith.truncf %15 : vector<16x512xf32> to vector<16x512xbf16>
    %c0_12 = arith.constant 0 : index
    %c0_13 = arith.constant 0 : index
    %17 = vector.load %arg6[%c0_12, %c0_13] : memref<512x128xbf16, #tpu.memory_space<vmem>>, vector<512x128xbf16>
    %cst_14 = arith.constant dense<0.000000e+00> : vector<16x128xf32>
    %18 = tpu.matmul %16, %17, %cst_14 {dimension_numbers = #tpu.dot_dimension_numbers<[1], [0], [0], [1], [0, 0, 1, 1], [], []>} : vector<16x512xbf16>, vector<512x128xbf16>, vector<16x128xf32> -> vector<16x128xf32>
    %c0_15 = arith.constant 0 : index
    %c0_16 = arith.constant 0 : index
    %19 = vector.load %arg7[%c0_15, %c0_16] : memref<1x128xf32, #tpu.memory_space<vmem>>, vector<1x128xf32>
    %20 = vector.broadcast %19 : vector<1x128xf32> to vector<16x128xf32>
    %21 = arith.addf %18, %20 : vector<16x128xf32>
    %c0_17 = arith.constant 0 : index
    %c0_18 = arith.constant 0 : index
    %22 = vector.load %arg8[%c0_17, %c0_18] : memref<16x128xf32, #tpu.memory_space<vmem>>, vector<16x128xf32>
    tpu.vector_store %arg8[%c0_17, %c0_18], %21 {strides = array<i32>} : memref<16x128xf32, #tpu.memory_space<vmem>>, vector<16x128xf32>,
    return
  }
  func.func @transform_0(%arg0: i32) -> (i32, i32) {
    %c0_i32 = arith.constant 0 : i32
    %c0_i32_0 = arith.constant 0 : i32
    return %arg0, %c0_i32 : i32, i32
  }
  func.func @transform_1(%arg0: i32) -> (i32, i32) {
    %c0_i32 = arith.constant 0 : i32
    %c0_i32_0 = arith.constant 0 : i32
    %c0_i32_1 = arith.constant 0 : i32
    return %c0_i32, %c0_i32_0 : i32, i32
  }
  func.func @transform_2(%arg0: i32) -> (i32, i32) {
    %c0_i32 = arith.constant 0 : i32
    %c0_i32_0 = arith.constant 0 : i32
    %c0_i32_1 = arith.constant 0 : i32
    return %c0_i32, %c0_i32_0 : i32, i32
  }
  func.func @transform_3(%arg0: i32) -> (i32, i32) {
    %c0_i32 = arith.constant 0 : i32
    %c0_i32_0 = arith.constant 0 : i32
    %c0_i32_1 = arith.constant 0 : i32
    return %c0_i32, %c0_i32_0 : i32, i32
  }
  func.func @transform_4(%arg0: i32) -> (i32, i32) {
    %c0_i32 = arith.constant 0 : i32
    %c0_i32_0 = arith.constant 0 : i32
    %c0_i32_1 = arith.constant 0 : i32
    return %c0_i32, %c0_i32_0 : i32, i32
  }
  func.func @transform_5(%arg0: i32) -> (i32, i32) {
    %c0_i32 = arith.constant 0 : i32
    %c0_i32_0 = arith.constant 0 : i32
    %c0_i32_1 = arith.constant 0 : i32
    return %c0_i32, %c0_i32_0 : i32, i32
  }
  func.func @transform_6(%arg0: i32) -> (i32, i32) {
    %c0_i32 = arith.constant 0 : i32
    %c0_i32_0 = arith.constant 0 : i32
    %c0_i32_1 = arith.constant 0 : i32
    return %c0_i32, %c0_i32_0 : i32, i32
  }
  func.func @transform_7(%arg0: i32) -> (i32, i32) {
    %c0_i32 = arith.constant 0 : i32
    %c0_i32_0 = arith.constant 0 : i32
    return %arg0, %c0_i32 : i32, i32
  }
}

</mosaic_0001>

<bundles_post_ra>
// kernel: three_layer_classifier.1
= control target key start
LH: loop header
LB: loop body
LE: loop exit
PB: predicated region body
PF: predicated region fallthrough
CT: control target
= control target key end

     0   :  { %12 = vsyncpa [#allocation3], 0  ;;  %s4021_s0 = inlined_call_operand.vmem [shape: bf16[16,128], index: 0, kind: input, shape index: {}]   ;;  %s4022_s1 = inlined_call_operand.hbm [shape: bf16[128,1024], index: 1, kind: input, shape index: {}]   ;;  %s4023_s2 = inlined_call_operand.vmem [shape: f32[1,1024], index: 2, kind: input, shape index: {}]   ;;  %s4024_s3 = inlined_call_operand.hbm [shape: bf16[1024,512], index: 3, kind: input, shape index: {}]   ;;  %s4025_s4 = inlined_call_operand.vmem [shape: f32[1,512], index: 4, kind: input, shape index: {}]   ;;  %s4026_s5 = inlined_call_operand.hbm [shape: bf16[512,128], index: 5, kind: input, shape index: {}]   ;;  %s4027_s6 = inlined_call_operand.vmem [shape: f32[1,128], index: 6, kind: input, shape index: {}]   ;;  %s4028_s7 = inlined_call_operand.vmem [shape: f32[16,128], index: 7, kind: output, shape index: {}]  }
   0x1   :  { %13 = vsyncpa [#allocation5], 0  ;;  %s3854_s24 = smov [#allocation4]  }
   0x2   :  { %s35_s25 = sshll.u32 %s3854_s24, 4  ;;  %s36_s25 = int_to_ptr.vmem [resolvable:$true] %s35_s25 }
   0x3   :  { %s3798_s26 = scalar_lea.vmem %s36_s25, 32768  ;;  %p3803_p1 = scmp.lt.s32.totalorder %s36_s25, %s36_s25 }
   0x4   :  { %p3799_p0 = scmp.ne.s32.totalorder %s36_s25, %s3798_s26  ;;  %p3804_p2 = scmp.lt.s32.totalorder %s3798_s26, %s3798_s26 }
   0x6   :  { %p3805_p3 = por %p3804_p2, %p3803_p1 }
   0x8   :  { %p3806_p4 = pnand %p3805_p3, %p3799_p0 }
   0xa   :  { %3809 = shalt.err (!%p3806_p4)
}
   0xb   :  { %s3855_s27 = smov 256   ;;  %s3856_s28 = smov 16  }
   0xc   :  { %41 = dma.hbm_to_vmem [thread:$0]  %s4024_s3, 32768, %s36_s25, [#allocation5], %s3855_s27, %s3855_s27, %s3856_s28  }
   0xd   :  { %s3857_s8 = smov [#allocation2]  }
   0xe   :  { %s21_s9 = sshll.u32 %s3857_s8, 4  ;;  %s22_s9 = int_to_ptr.vmem [resolvable:$true] %s21_s9 }
   0xf   :  { %s3818_s10 = scalar_lea.vmem %s22_s9, 8192  ;;  %p3823_p6 = scmp.lt.s32.totalorder %s22_s9, %s22_s9 }
  0x10   :  { %p3819_p5 = scmp.ne.s32.totalorder %s22_s9, %s3818_s10  ;;  %p3824_p7 = scmp.lt.s32.totalorder %s3818_s10, %s3818_s10 }
  0x12   :  { %p3825_p8 = por %p3824_p7, %p3823_p6 }
  0x14   :  { %p3826_p9 = pnand %p3825_p8, %p3819_p5 }
  0x16   :  { %3829 = shalt.err (!%p3826_p9)
}
  0x17   :  { %s3858_s11 = smov 512   ;;  %s3859_s12 = smov 32  }
  0x18   :  { %27 = dma.hbm_to_vmem [thread:$0]  %s4022_s1, 8192, %s22_s9, [#allocation3], %s3858_s11, %s3858_s11, %s3859_s12  }
  0x19   :  { %s3860_s15 = smov [#allocation6]  }
  0x1a   :  { %s49_s16 = sshll.u32 %s3860_s15, 4  ;;  %s50_s16 = int_to_ptr.vmem [resolvable:$true] %s49_s16 }
  0x1b   :  { %s3838_s3 = scalar_lea.vmem %s50_s16, 4096  ;;  %p3843_p11 = scmp.lt.s32.totalorder %s50_s16, %s50_s16 }
  0x1c   :  { %p3839_p10 = scmp.ne.s32.totalorder %s50_s16, %s3838_s3  ;;  %p3844_p12 = scmp.lt.s32.totalorder %s3838_s3, %s3838_s3 }
  0x1e   :  { %p3845_p13 = por %p3844_p12, %p3843_p11 }
  0x20   :  { %p3846_p0 = pnand %p3845_p13, %p3839_p10 }
  0x22   :  { %3849 = shalt.err (!%p3846_p0)
}
  0x23   :  { %s3861_s17 = smov 64   ;;  %s3862_s18 = smov 4  }
  0x24   :  { %55 = dma.hbm_to_vmem [thread:$0]  %s4026_s5, 4096, %s50_s16, [#allocation5], %s3861_s17, %s3861_s17, %s3862_s18  }
  0x25   :  { %3850 = dma.done.wait [#allocation3], 8192  }
  0x26   :  { %3851 = vsyncadd [#allocation3], 4294959104 }
  0x27   :  { %3852 = dma.done.wait [#allocation5], 36864  }
  0x28   :  { %3853 = vsyncadd [#allocation5], 4294930432  ;;  %v3863_v0 = vmov 0   ;;  %v126_v1 = vld [vmem:[#allocation2 + $0x1c0] sm:$0xff]  ;;  %v127_v3 = vld [vmem:[#allocation2 + $0x1c8] sm:$0xff] }
  0x29   :  { %534 = vmatprep.mubr.bf16.mxu0 %v3863_v0  ;;  %577 = vmatprep.mubr.bf16.mxu1 %v3863_v0  ;;  %v130_v2 = vld [vmem:[#allocation2 + $0x1e0] sm:$0xff]  ;;  %v131_v5 = vld [vmem:[#allocation2 + $0x1e8] sm:$0xff]  ;;  %v128_v62 = vld [vmem:[#allocation2 + $0x1d0] sm:$0xff] }
  0x2a   :  { %v3023_v4 = vcombine.high %v126_v1, %v130_v2  ;;  %v3022_v6 = vcombine.low %v126_v1, %v130_v2  ;;  %v118_v7 = vld [vmem:[#allocation2 + $0x180] sm:$0xff]  ;;  %v3025_v9 = vcombine.high %v127_v3, %v131_v5  ;;  %v3024_v10 = vcombine.low %v127_v3, %v131_v5  ;;  %v119_v12 = vld [vmem:[#allocation2 + $0x188] sm:$0xff]  ;;  %v132_v1 = vld [vmem:[#allocation2 + $0x1f0] sm:$0xff] }
  0x2b   :  { %v122_v8 = vld [vmem:[#allocation2 + $0x1a0] sm:$0xff]  ;;  %v123_v13 = vld [vmem:[#allocation2 + $0x1a8] sm:$0xff]  ;;  %v129_v2 = vld [vmem:[#allocation2 + $0x1d8] sm:$0xff] }
  0x2c   :  { %v3015_v11 = vcombine.high %v118_v7, %v122_v8  ;;  %v110_v14 = vld [vmem:[#allocation2 + $0x140] sm:$0xff]  ;;  %502 = vmatprep.subr.bf16.mxu0 %v3023_v4  ;;  %v3017_v15 = vcombine.high %v119_v12, %v123_v13  ;;  %v111_v17 = vld [vmem:[#allocation2 + $0x148] sm:$0xff]  ;;  %545 = vmatprep.subr.bf16.mxu1 %v3025_v9  ;;  %v3014_v19 = vcombine.low %v118_v7, %v122_v8  ;;  %v133_v3 = vld [vmem:[#allocation2 + $0x1f8] sm:$0xff] }
  0x2d   :  { %v114_v16 = vld [vmem:[#allocation2 + $0x160] sm:$0xff]  ;;  %v115_v18 = vld [vmem:[#allocation2 + $0x168] sm:$0xff]  ;;  %503 = vmatpush1.bf16.msra.mxu0 %v3022_v6  ;;  %546 = vmatpush1.bf16.msra.mxu1 %v3024_v10  ;;  %v3016_v20 = vcombine.low %v119_v12, %v123_v13  ;;  %v3027_v7 = vcombine.high %v128_v62, %v132_v1  ;;  %v120_v8 = vld [vmem:[#allocation2 + $0x190] sm:$0xff]  ;;  %v3029_v9 = vcombine.high %v129_v2, %v133_v3 }
  0x2e   :  { %504 = vmatprep.subr.bf16.mxu0 %v3015_v11  ;;  %v3007_v21 = vcombine.high %v110_v14, %v114_v16  ;;  %547 = vmatprep.subr.bf16.mxu1 %v3017_v15  ;;  %v3009_v22 = vcombine.high %v111_v17, %v115_v18  ;;  %v102_v23 = vld [vmem:[#allocation2 + $0x100] sm:$0xff]  ;;  %v103_v25 = vld [vmem:[#allocation2 + $0x108] sm:$0xff]  ;;  %v3006_v27 = vcombine.low %v110_v14, %v114_v16  ;;  %v124_v10 = vld [vmem:[#allocation2 + $0x1b0] sm:$0xff] }
  0x2f   :  { %v106_v24 = vld [vmem:[#allocation2 + $0x120] sm:$0xff]  ;;  %v107_v26 = vld [vmem:[#allocation2 + $0x128] sm:$0xff]  ;;  %v3008_v28 = vcombine.low %v111_v17, %v115_v18  ;;  %v121_v11 = vld [vmem:[#allocation2 + $0x198] sm:$0xff]  ;;  %v3026_v13 = vcombine.low %v128_v62, %v132_v1  ;;  %v3028_v14 = vcombine.low %v129_v2, %v133_v3  ;;  %v3019_v15 = vcombine.high %v120_v8, %v124_v10 }
  0x30   :  { %v2999_v29 = vcombine.high %v102_v23, %v106_v24  ;;  %v3001_v30 = vcombine.high %v103_v25, %v107_v26  ;;  %v94_v31 = vld [vmem:[#allocation2 + $0xc0] sm:$0xff]  ;;  %v95_v33 = vld [vmem:[#allocation2 + $0xc8] sm:$0xff]  ;;  %v2998_v35 = vcombine.low %v102_v23, %v106_v24  ;;  %v3000_v36 = vcombine.low %v103_v25, %v107_v26  ;;  %v125_v12 = vld [vmem:[#allocation2 + $0x1b8] sm:$0xff] }
  0x31   :  { %505 = vmatpush1.bf16.msra.mxu0 %v3014_v19  ;;  %548 = vmatpush1.bf16.msra.mxu1 %v3016_v20  ;;  %v98_v32 = vld [vmem:[#allocation2 + $0xe0] sm:$0xff]  ;;  %v99_v34 = vld [vmem:[#allocation2 + $0xe8] sm:$0xff]  ;;  %v112_v16 = vld [vmem:[#allocation2 + $0x150] sm:$0xff]  ;;  %v3021_v17 = vcombine.high %v121_v11, %v125_v12 }
  0x32   :  { %506 = vmatprep.subr.bf16.mxu0 %v3007_v21  ;;  %549 = vmatprep.subr.bf16.mxu1 %v3009_v22  ;;  %v2991_v37 = vcombine.high %v94_v31, %v98_v32  ;;  %v2993_v38 = vcombine.high %v95_v33, %v99_v34  ;;  %v86_v39 = vld [vmem:[#allocation2 + $0x80] sm:$0xff]  ;;  %v87_v41 = vld [vmem:[#allocation2 + $0x88] sm:$0xff]  ;;  %v2990_v43 = vcombine.low %v94_v31, %v98_v32  ;;  %v116_v18 = vld [vmem:[#allocation2 + $0x170] sm:$0xff] }
  0x33   :  { %v90_v40 = vld [vmem:[#allocation2 + $0xa0] sm:$0xff]  ;;  %v91_v42 = vld [vmem:[#allocation2 + $0xa8] sm:$0xff]  ;;  %v2992_v44 = vcombine.low %v95_v33, %v99_v34  ;;  %v113_v19 = vld [vmem:[#allocation2 + $0x158] sm:$0xff]  ;;  %v3018_v21 = vcombine.low %v120_v8, %v124_v10  ;;  %v3020_v22 = vcombine.low %v121_v11, %v125_v12  ;;  %v3011_v23 = vcombine.high %v112_v16, %v116_v18 }
  0x34   :  { %v2983_v45 = vcombine.high %v86_v39, %v90_v40  ;;  %v2985_v46 = vcombine.high %v87_v41, %v91_v42  ;;  %v78_v47 = vld [vmem:[#allocation2 + $0x40] sm:$0xff]  ;;  %v79_v49 = vld [vmem:[#allocation2 + $0x48] sm:$0xff]  ;;  %v2982_v51 = vcombine.low %v86_v39, %v90_v40  ;;  %v2984_v52 = vcombine.low %v87_v41, %v91_v42  ;;  %v117_v20 = vld [vmem:[#allocation2 + $0x178] sm:$0xff] }
  0x35   :  { %507 = vmatpush1.bf16.msra.mxu0 %v3006_v27  ;;  %550 = vmatpush1.bf16.msra.mxu1 %v3008_v28  ;;  %v82_v48 = vld [vmem:[#allocation2 + $0x60] sm:$0xff]  ;;  %v83_v50 = vld [vmem:[#allocation2 + $0x68] sm:$0xff]  ;;  %v104_v24 = vld [vmem:[#allocation2 + $0x110] sm:$0xff]  ;;  %v3013_v25 = vcombine.high %v113_v19, %v117_v20 }
  0x36   :  { %508 = vmatprep.subr.bf16.mxu0 %v2999_v29  ;;  %551 = vmatprep.subr.bf16.mxu1 %v3001_v30  ;;  %v2975_v53 = vcombine.high %v78_v47, %v82_v48  ;;  %v70_v54 = vld [vmem:[#allocation2] sm:$0xff]  ;;  %v2977_v55 = vcombine.high %v79_v49, %v83_v50  ;;  %v71_v57 = vld [vmem:[#allocation2 + $0x8] sm:$0xff]  ;;  %v2974_v59 = vcombine.low %v78_v47, %v82_v48  ;;  %v108_v26 = vld [vmem:[#allocation2 + $0x130] sm:$0xff] }
  0x37   :  { %v74_v56 = vld [vmem:[#allocation2 + $0x20] sm:$0xff]  ;;  %v75_v58 = vld [vmem:[#allocation2 + $0x28] sm:$0xff]  ;;  %v2976_v60 = vcombine.low %v79_v49, %v83_v50  ;;  %v105_v27 = vld [vmem:[#allocation2 + $0x118] sm:$0xff]  ;;  %v3010_v29 = vcombine.low %v112_v16, %v116_v18  ;;  %v3012_v30 = vcombine.low %v113_v19, %v117_v20  ;;  %v3003_v31 = vcombine.high %v104_v24, %v108_v26 }
  0x38   :  { %v2967_v61 = vcombine.high %v70_v54, %v74_v56  ;;  %v2969_v63 = vcombine.high %v71_v57, %v75_v58  ;;  %v2966_v4 = vcombine.low %v70_v54, %v74_v56  ;;  %v2968_v5 = vcombine.low %v71_v57, %v75_v58  ;;  %v3918_v6 = vld [vmem:[%s4021_s0] sm:$0xff]   ;;  %v109_v28 = vld [vmem:[#allocation2 + $0x138] sm:$0xff]  ;;  %v96_v32 = vld [vmem:[#allocation2 + $0xd0] sm:$0xff] }
  0x39   :  { %509 = vmatpush1.bf16.msra.mxu0 %v2998_v35  ;;  %552 = vmatpush1.bf16.msra.mxu1 %v3000_v36  ;;  %v3005_v33 = vcombine.high %v105_v27, %v109_v28  ;;  %v100_v34 = vld [vmem:[#allocation2 + $0xf0] sm:$0xff]  ;;  %v97_v35 = vld [vmem:[#allocation2 + $0xd8] sm:$0xff] }
  0x3a   :  { %510 = vmatprep.subr.bf16.mxu0 %v2991_v37  ;;  %553 = vmatprep.subr.bf16.mxu1 %v2993_v38  ;;  %v101_v36 = vld [vmem:[#allocation2 + $0xf8] sm:$0xff]  ;;  %v3002_v37 = vcombine.low %v104_v24, %v108_v26  ;;  %v3004_v38 = vcombine.low %v105_v27, %v109_v28  ;;  %v2995_v39 = vcombine.high %v96_v32, %v100_v34  ;;  %v88_v40 = vld [vmem:[#allocation2 + $0x90] sm:$0xff] }
  0x3b   :  { %v92_v41 = vld [vmem:[#allocation2 + $0xb0] sm:$0xff]  ;;  %v89_v42 = vld [vmem:[#allocation2 + $0x98] sm:$0xff] }
  0x3c   :  { %v80_v47 = vld [vmem:[#allocation2 + $0x50] sm:$0xff]  ;;  %v81_v50 = vld [vmem:[#allocation2 + $0x58] sm:$0xff] }
  0x3d   :  { %511 = vmatpush1.bf16.msra.mxu0 %v2990_v43  ;;  %554 = vmatpush1.bf16.msra.mxu1 %v2992_v44  ;;  %v93_v43 = vld [vmem:[#allocation2 + $0xb8] sm:$0xff]  ;;  %v2994_v44 = vcombine.low %v96_v32, %v100_v34  ;;  %v84_v49 = vld [vmem:[#allocation2 + $0x70] sm:$0xff] }
  0x3e   :  { %512 = vmatprep.subr.bf16.mxu0 %v2983_v45  ;;  %555 = vmatprep.subr.bf16.mxu1 %v2985_v46  ;;  %v2996_v45 = vcombine.low %v97_v35, %v101_v36  ;;  %v2987_v46 = vcombine.high %v88_v40, %v92_v41  ;;  %v2989_v48 = vcombine.high %v89_v42, %v93_v43  ;;  %v76_v57 = vld [vmem:[#allocation2 + $0x30] sm:$0xff]  ;;  %v73_v58 = vld [vmem:[#allocation2 + $0x18] sm:$0xff] }
  0x3f   :  { %v2979_v54 = vcombine.high %v80_v47, %v84_v49  ;;  %v3376_v1 = vld [vmem:[#allocation4 + $0xe4] ss:$16 sps:$4 sm:$0xff]   ;;  %v3380_v10 = vld [vmem:[#allocation4 + $0xc0] ss:$16 sps:$4 sm:$0xff]  }
  0x40   :  { %v3379_v3 = vld [vmem:[#allocation4 + $0x2e4] ss:$16 sps:$4 sm:$0xff]   ;;  %v3383_v11 = vld [vmem:[#allocation4 + $0x2c0] ss:$16 sps:$4 sm:$0xff]  }
  0x41   :  { %513 = vmatpush1.bf16.msra.mxu0 %v2982_v51  ;;  %556 = vmatpush1.bf16.msra.mxu1 %v2984_v52  ;;  %v85_v51 = vld [vmem:[#allocation2 + $0x78] sm:$0xff]  ;;  %v2986_v52 = vcombine.low %v88_v40, %v92_v41  ;;  %v3382_v8 = vld [vmem:[#allocation4 + $0xc4] ss:$16 sps:$4 sm:$0xff]   ;;  %v3392_v18 = vld [vmem:[#allocation4 + $0x80] ss:$16 sps:$4 sm:$0xff]  }
  0x42   :  { %514 = vmatprep.subr.bf16.mxu0 %v2975_v53  ;;  %557 = vmatprep.subr.bf16.mxu1 %v2977_v55  ;;  %v2988_v53 = vcombine.low %v89_v42, %v93_v43  ;;  %v72_v55 = vld [vmem:[#allocation2 + $0x10] sm:$0xff]  ;;  %v2981_v56 = vcombine.high %v81_v50, %v85_v51 }
  0x43   :  { %v2971_v62 = vcombine.high %v72_v55, %v76_v57  ;;  %v2970_v2 = vcombine.low %v72_v55, %v76_v57  ;;  %v3388_v12 = vld [vmem:[#allocation4 + $0xa4] ss:$16 sps:$4 sm:$0xff]   ;;  %v3395_v19 = vld [vmem:[#allocation4 + $0x280] ss:$16 sps:$4 sm:$0xff]  }
  0x44   :  { %v3394_v16 = vld [vmem:[#allocation4 + $0x84] ss:$16 sps:$4 sm:$0xff]   ;;  %v3407_v26 = vld [vmem:[#allocation4 + $0x240] ss:$16 sps:$4 sm:$0xff]  }
  0x45   :  { %515 = vmatpush1.bf16.msra.mxu0 %v2974_v59  ;;  %558 = vmatpush1.bf16.msra.mxu1 %v2976_v60  ;;  %v77_v59 = vld [vmem:[#allocation2 + $0x38] sm:$0xff]  ;;  %v2978_v60 = vcombine.low %v80_v47, %v84_v49  ;;  %v3400_v20 = vld [vmem:[#allocation4 + $0x64] ss:$16 sps:$4 sm:$0xff]   ;;  %v3419_v34 = vld [vmem:[#allocation4 + $0x200] ss:$16 sps:$4 sm:$0xff]  }
  0x46   :  { %516 = vmatprep.subr.bf16.mxu0 %v2967_v61  ;;  %559 = vmatprep.subr.bf16.mxu1 %v2969_v63  ;;  %v2980_v61 = vcombine.low %v81_v50, %v85_v51  ;;  %v2973_v63 = vcombine.high %v73_v58, %v77_v59  ;;  %v3409_v24 = vld [vmem:[#allocation4 + $0x244] ss:$16 sps:$4 sm:$0xff]   ;;  %v3431_v41 = vld [vmem:[#allocation4 + $0x3c0] ss:$16 sps:$4 sm:$0xff]  }
  0x47   :  { %v3412_v27 = vld [vmem:[#allocation4 + $0x24] ss:$16 sps:$4 sm:$0xff]   ;;  %v3443_v49 = vld [vmem:[#allocation4 + $0x380] ss:$16 sps:$4 sm:$0xff]  }
  0x48   :  { %v3415_v28 = vld [vmem:[#allocation4 + $0x224] ss:$16 sps:$4 sm:$0xff]   ;;  %v3455_v57 = vld [vmem:[#allocation4 + $0x340] ss:$16 sps:$4 sm:$0xff]  }
  0x49   :  { %517 = vmatpush1.bf16.msra.mxu0 %v2966_v4  ;;  %560 = vmatpush1.bf16.msra.mxu1 %v2968_v5  ;;  %v2972_v4 = vcombine.low %v73_v58, %v77_v59  ;;  %v3374_v5 = vld [vmem:[#allocation4 + $0xe0] ss:$16 sps:$4 sm:$0xff]   ;;  %v3421_v32 = vld [vmem:[#allocation4 + $0x204] ss:$16 sps:$4 sm:$0xff]  }
  0x4a   :  { %588 = vmatprep.subr.bf16.mxu0 %v3027_v7  ;;  %631 = vmatprep.subr.bf16.mxu1 %v3029_v9  ;;  %v3377_v7 = vld [vmem:[#allocation4 + $0x2e0] ss:$16 sps:$4 sm:$0xff]   ;;  %v3385_v9 = vld [vmem:[#allocation4 + $0x2c4] ss:$16 sps:$4 sm:$0xff]  }
  0x4b   :  { %v3433_v40 = vld [vmem:[#allocation4 + $0x3c4] ss:$16 sps:$4 sm:$0xff]  }
  0x4c   :  { %535 = vmatmul.mubr.bf16.vlgmr.msra.gmra.mxu0 %v3918_v6  ;;  %578 = vmatmul.mubr.bf16.vlgmr.msra.gmra.mxu1 %v3918_v6  ;;  %v3436_v42 = vld [vmem:[#allocation4 + $0x1a4] ss:$16 sps:$4 sm:$0xff]  }
  0x4d   :  { %589 = vmatpush1.bf16.msra.mxu0 %v3026_v13  ;;  %632 = vmatpush1.bf16.msra.mxu1 %v3028_v14  ;;  %v3391_v13 = vld [vmem:[#allocation4 + $0x2a4] ss:$16 sps:$4 sm:$0xff]   ;;  %v3386_v14 = vld [vmem:[#allocation4 + $0xa0] ss:$16 sps:$4 sm:$0xff]  }
  0x4e   :  { %590 = vmatprep.subr.bf16.mxu0 %v3019_v15  ;;  %633 = vmatprep.subr.bf16.mxu1 %v3021_v17  ;;  %v3389_v15 = vld [vmem:[#allocation4 + $0x2a0] ss:$16 sps:$4 sm:$0xff]   ;;  %v3397_v17 = vld [vmem:[#allocation4 + $0x284] ss:$16 sps:$4 sm:$0xff]  }
  0x4f   :  { %620 = vmatprep.mubr.bf16.mxu0 %v3863_v0  ;;  %663 = vmatprep.mubr.bf16.mxu1 %v3863_v0  ;;  %v2997_v0 = vcombine.high %v97_v35, %v101_v36  ;;  %v3424_v35 = vld [vmem:[#allocation4 + $0x1e4] ss:$16 sps:$4 sm:$0xff]  }
  0x50   :  { %v3427_v36 = vld [vmem:[#allocation4 + $0x3e4] ss:$16 sps:$4 sm:$0xff]  }
  0x51   :  { %591 = vmatpush1.bf16.msra.mxu0 %v3018_v21  ;;  %634 = vmatpush1.bf16.msra.mxu1 %v3020_v22  ;;  %v3403_v21 = vld [vmem:[#allocation4 + $0x264] ss:$16 sps:$4 sm:$0xff]   ;;  %v3401_v22 = vld [vmem:[#allocation4 + $0x260] ss:$16 sps:$4 sm:$0xff]  }
  0x52   :  { %592 = vmatprep.subr.bf16.mxu0 %v3011_v23  ;;  %635 = vmatprep.subr.bf16.mxu1 %v3013_v25  ;;  %v3406_v23 = vld [vmem:[#allocation4 + $0x44] ss:$16 sps:$4 sm:$0xff]   ;;  %v3404_v25 = vld [vmem:[#allocation4 + $0x40] ss:$16 sps:$4 sm:$0xff]  }
  0x53   :  { %v3439_v43 = vld [vmem:[#allocation4 + $0x3a4] ss:$16 sps:$4 sm:$0xff]  }
  0x54   :  { %v3445_v47 = vld [vmem:[#allocation4 + $0x384] ss:$16 sps:$4 sm:$0xff]  }
  0x55   :  { %593 = vmatpush1.bf16.msra.mxu0 %v3010_v29  ;;  %636 = vmatpush1.bf16.msra.mxu1 %v3012_v30  ;;  %v3410_v29 = vld [vmem:[#allocation4 + $0x20] ss:$16 sps:$4 sm:$0xff]   ;;  %v3448_v50 = vld [vmem:[#allocation4 + $0x164] ss:$16 sps:$4 sm:$0xff]  }
  0x56   :  { %594 = vmatprep.subr.bf16.mxu0 %v3003_v31  ;;  %637 = vmatprep.subr.bf16.mxu1 %v3005_v33  ;;  %v3413_v30 = vld [vmem:[#allocation4 + $0x220] ss:$16 sps:$4 sm:$0xff]   ;;  %v3418_v31 = vld [vmem:[#allocation4 + $0x4] ss:$16 sps:$4 sm:$0xff]  }
  0x57   :  { %v3416_v33 = vld [vmem:[#allocation4] ss:$16 sps:$4 sm:$0xff]   ;;  %v3451_v51 = vld [vmem:[#allocation4 + $0x364] ss:$16 sps:$4 sm:$0xff]  }
  0x58   :  { %v3457_v55 = vld [vmem:[#allocation4 + $0x344] ss:$16 sps:$4 sm:$0xff]  }
  0x59   :  { %595 = vmatpush1.bf16.msra.mxu0 %v3002_v37  ;;  %638 = vmatpush1.bf16.msra.mxu1 %v3004_v38  ;;  %v3422_v37 = vld [vmem:[#allocation4 + $0x1e0] ss:$16 sps:$4 sm:$0xff]   ;;  %v3460_v58 = vld [vmem:[#allocation4 + $0x124] ss:$16 sps:$4 sm:$0xff]  }
  0x5a   :  { %596 = vmatprep.subr.bf16.mxu0 %v2995_v39  ;;  %639 = vmatprep.subr.bf16.mxu1 %v2997_v0  ;;  %v3425_v38 = vld [vmem:[#allocation4 + $0x3e0] ss:$16 sps:$4 sm:$0xff]   ;;  %v3430_v39 = vld [vmem:[#allocation4 + $0x1c4] ss:$16 sps:$4 sm:$0xff]  }
  0x5b   :  { %v3428_v0 = vld [vmem:[#allocation4 + $0x1c0] ss:$16 sps:$4 sm:$0xff]   ;;  %v3463_v59 = vld [vmem:[#allocation4 + $0x324] ss:$16 sps:$4 sm:$0xff]  }
  0x5d   :  { %597 = vmatpush1.bf16.msra.mxu0 %v2994_v44  ;;  %640 = vmatpush1.bf16.msra.mxu1 %v2996_v45  ;;  %v3434_v44 = vld [vmem:[#allocation4 + $0x1a0] ss:$16 sps:$4 sm:$0xff]  }
  0x5e   :  { %598 = vmatprep.subr.bf16.mxu0 %v2987_v46  ;;  %641 = vmatprep.subr.bf16.mxu1 %v2989_v48  ;;  %v3437_v45 = vld [vmem:[#allocation4 + $0x3a0] ss:$16 sps:$4 sm:$0xff]   ;;  %v3442_v46 = vld [vmem:[#allocation4 + $0x184] ss:$16 sps:$4 sm:$0xff]  }
  0x5f   :  { %v3440_v48 = vld [vmem:[#allocation4 + $0x180] ss:$16 sps:$4 sm:$0xff]  }
  0x61   :  { %599 = vmatpush1.bf16.msra.mxu0 %v2986_v52  ;;  %642 = vmatpush1.bf16.msra.mxu1 %v2988_v53  ;;  %v3446_v52 = vld [vmem:[#allocation4 + $0x160] ss:$16 sps:$4 sm:$0xff]  }
  0x62   :  { %600 = vmatprep.subr.bf16.mxu0 %v2979_v54  ;;  %643 = vmatprep.subr.bf16.mxu1 %v2981_v56  ;;  %v3449_v53 = vld [vmem:[#allocation4 + $0x360] ss:$16 sps:$4 sm:$0xff]   ;;  %v3454_v54 = vld [vmem:[#allocation4 + $0x144] ss:$16 sps:$4 sm:$0xff]  }
  0x63   :  { %v3452_v56 = vld [vmem:[#allocation4 + $0x140] ss:$16 sps:$4 sm:$0xff]  }
  0x65   :  { %601 = vmatpush1.bf16.msra.mxu0 %v2978_v60  ;;  %644 = vmatpush1.bf16.msra.mxu1 %v2980_v61  ;;  %v3458_v60 = vld [vmem:[#allocation4 + $0x120] ss:$16 sps:$4 sm:$0xff]  }
  0x66   :  { %602 = vmatprep.subr.bf16.mxu0 %v2971_v62  ;;  %645 = vmatprep.subr.bf16.mxu1 %v2973_v63  ;;  %v3461_v61 = vld [vmem:[#allocation4 + $0x320] ss:$16 sps:$4 sm:$0xff]   ;;  %v3466_v62 = vld [vmem:[#allocation4 + $0x104] ss:$16 sps:$4 sm:$0xff]  }
  0x67   :  { %v3469_v63 = vld [vmem:[#allocation4 + $0x304] ss:$16 sps:$4 sm:$0xff]  }
  0x69   :  { %603 = vmatpush1.bf16.msra.mxu0 %v2970_v2  ;;  %646 = vmatpush1.bf16.msra.mxu1 %v2972_v4  ;;  %v3467_v2 = vld [vmem:[#allocation4 + $0x300] ss:$16 sps:$4 sm:$0xff]   ;;  %v3475_v4 = vld [vmem:[#allocation4 + $0x6e4] ss:$16 sps:$4 sm:$0xff]  }
  0x6a   :  { %2256 = vmatprep.subr.bf16.mxu0 %v3376_v1  ;;  %2299 = vmatprep.subr.bf16.mxu1 %v3379_v3  ;;  %v3464_v1 = vld [vmem:[#allocation4 + $0x100] ss:$16 sps:$4 sm:$0xff]   ;;  %v3472_v3 = vld [vmem:[#allocation4 + $0x4e4] ss:$16 sps:$4 sm:$0xff]  }
  0x6c   :  { %621 = vmatmul.mubr.bf16.vlgmr.msra.gmra.mxu0 %v3918_v6  ;;  %664 = vmatmul.mubr.bf16.vlgmr.msra.gmra.mxu1 %v3918_v6  ;;  %v3398_v6 = vld [vmem:[#allocation4 + $0x60] ss:$16 sps:$4 sm:$0xff]  }
  0x6d   :  { %2257 = vmatpush1.bf16.msra.mxu0 %v3374_v5  ;;  %2300 = vmatpush1.bf16.msra.mxu1 %v3377_v7  ;;  %v136_v5 = vlaneseq }
  0x6e   :  { %2258 = vmatprep.subr.bf16.mxu0 %v3382_v8  ;;  %2301 = vmatprep.subr.bf16.mxu1 %v3385_v9 }
  0x6f   :  { %v3926_v7 = vshrl.u32 %v136_v5, 7  ;;  %v3508_v5 = vld [vmem:[#allocation4 + $0x424] ss:$16 sps:$4 sm:$0xff]  }
  0x71   :  { %2259 = vmatpush1.bf16.msra.mxu0 %v3380_v10  ;;  %2302 = vmatpush1.bf16.msra.mxu1 %v3383_v11  ;;  %v142_v8 = vsub.s32 1, %v3926_v7  ;;  %v138_v9 = vsub.s32 0, %v3926_v7  ;;  %v150_v10 = vsub.s32 3, %v3926_v7  ;;  %v3934_v11 = vld [vmem:[%s4023_s2] sm:$0xff] }
  0x72   :  { %2260 = vmatprep.subr.bf16.mxu0 %v3388_v12  ;;  %2303 = vmatprep.subr.bf16.mxu1 %v3391_v13  ;;  %v146_v12 = vsub.s32 2, %v3926_v7 }
  0x75   :  { %2261 = vmatpush1.bf16.msra.mxu0 %v3386_v14  ;;  %2304 = vmatpush1.bf16.msra.mxu1 %v3389_v15  ;;  %v143_v15 = vrot.slane %v3934_v11, %v142_v8 }
  0x76   :  { %2262 = vmatprep.subr.bf16.mxu0 %v3394_v16  ;;  %2305 = vmatprep.subr.bf16.mxu1 %v3397_v17  ;;  %v139_v16 = vrot.slane %v3934_v11, %v138_v9 }
  0x79   :  { %2263 = vmatpush1.bf16.msra.mxu0 %v3392_v18  ;;  %2306 = vmatpush1.bf16.msra.mxu1 %v3395_v19  ;;  %v151_v18 = vrot.slane %v3934_v11, %v150_v10  ;;  %v147_v19 = vrot.slane %v3934_v11, %v146_v12 }
  0x7a   :  { %2264 = vmatprep.subr.bf16.mxu0 %v3400_v20  ;;  %2307 = vmatprep.subr.bf16.mxu1 %v3403_v21 }
  0x7d   :  { %2265 = vmatpush1.bf16.msra.mxu0 %v3398_v6  ;;  %2308 = vmatpush1.bf16.msra.mxu1 %v3401_v22 }
  0x7e   :  { %2266 = vmatprep.subr.bf16.mxu0 %v3406_v23  ;;  %2309 = vmatprep.subr.bf16.mxu1 %v3409_v24 }
  0x81   :  { %2267 = vmatpush1.bf16.msra.mxu0 %v3404_v25  ;;  %2310 = vmatpush1.bf16.msra.mxu1 %v3407_v26 }
  0x82   :  { %2268 = vmatprep.subr.bf16.mxu0 %v3412_v27  ;;  %2311 = vmatprep.subr.bf16.mxu1 %v3415_v28 }
  0x85   :  { %2269 = vmatpush1.bf16.msra.mxu0 %v3410_v29  ;;  %2312 = vmatpush1.bf16.msra.mxu1 %v3413_v30 }
  0x86   :  { %2270 = vmatprep.subr.bf16.mxu0 %v3418_v31  ;;  %2313 = vmatprep.subr.bf16.mxu1 %v3421_v32 }
  0x89   :  { %2271 = vmatpush1.bf16.msra.mxu0 %v3416_v33  ;;  %2314 = vmatpush1.bf16.msra.mxu1 %v3419_v34 }
  0x8a   :  { %2272 = vmatprep.subr.bf16.mxu0 %v3424_v35  ;;  %2315 = vmatprep.subr.bf16.mxu1 %v3427_v36 }
  0x8d   :  { %2273 = vmatpush2.bf16.msra.mxu0 %v3422_v37  ;;  %2316 = vmatpush2.bf16.msra.mxu1 %v3425_v38 }
  0x8e   :  { %2274 = vmatprep.subr.bf16.mxu0 %v3430_v39  ;;  %2317 = vmatprep.subr.bf16.mxu1 %v3433_v40 }
  0x91   :  { %2275 = vmatpush2.bf16.msra.mxu0 %v3428_v0  ;;  %2318 = vmatpush2.bf16.msra.mxu1 %v3431_v41  ;;  %v3470_v0 = vld [vmem:[#allocation4 + $0x4e0] ss:$16 sps:$4 sm:$0xff]  }
  0x92   :  { %2276 = vmatprep.subr.bf16.mxu0 %v3436_v42  ;;  %2319 = vmatprep.subr.bf16.mxu1 %v3439_v43  ;;  %v3473_v43 = vld [vmem:[#allocation4 + $0x6e0] ss:$16 sps:$4 sm:$0xff]  }
  0x95   :  { %2277 = vmatpush2.bf16.msra.mxu0 %v3434_v44  ;;  %2320 = vmatpush2.bf16.msra.mxu1 %v3437_v45  ;;  %v3478_v44 = vld [vmem:[#allocation4 + $0x4c4] ss:$16 sps:$4 sm:$0xff]  }
  0x96   :  { %2278 = vmatprep.subr.bf16.mxu0 %v3442_v46  ;;  %2321 = vmatprep.subr.bf16.mxu1 %v3445_v47  ;;  %v3481_v46 = vld [vmem:[#allocation4 + $0x6c4] ss:$16 sps:$4 sm:$0xff]   ;;  %v3476_v47 = vld [vmem:[#allocation4 + $0x4c0] ss:$16 sps:$4 sm:$0xff]  }
  0x99   :  { %2279 = vmatpush2.bf16.msra.mxu0 %v3440_v48  ;;  %2322 = vmatpush2.bf16.msra.mxu1 %v3443_v49  ;;  %v3479_v48 = vld [vmem:[#allocation4 + $0x6c0] ss:$16 sps:$4 sm:$0xff]   ;;  %v3484_v49 = vld [vmem:[#allocation4 + $0x4a4] ss:$16 sps:$4 sm:$0xff]  }
  0x9a   :  { %2280 = vmatprep.subr.bf16.mxu0 %v3448_v50  ;;  %2323 = vmatprep.subr.bf16.mxu1 %v3451_v51  ;;  %v3487_v50 = vld [vmem:[#allocation4 + $0x6a4] ss:$16 sps:$4 sm:$0xff]   ;;  %v3482_v51 = vld [vmem:[#allocation4 + $0x4a0] ss:$16 sps:$4 sm:$0xff]  }
  0x9d   :  { %2281 = vmatpush2.bf16.msra.mxu0 %v3446_v52  ;;  %2324 = vmatpush2.bf16.msra.mxu1 %v3449_v53  ;;  %v3485_v52 = vld [vmem:[#allocation4 + $0x6a0] ss:$16 sps:$4 sm:$0xff]   ;;  %v3490_v53 = vld [vmem:[#allocation4 + $0x484] ss:$16 sps:$4 sm:$0xff]  }
  0x9e   :  { %2282 = vmatprep.subr.bf16.mxu0 %v3454_v54  ;;  %2325 = vmatprep.subr.bf16.mxu1 %v3457_v55  ;;  %v3493_v54 = vld [vmem:[#allocation4 + $0x684] ss:$16 sps:$4 sm:$0xff]   ;;  %v3488_v55 = vld [vmem:[#allocation4 + $0x480] ss:$16 sps:$4 sm:$0xff]  }
  0xa1   :  { %2283 = vmatpush2.bf16.msra.mxu0 %v3452_v56  ;;  %2326 = vmatpush2.bf16.msra.mxu1 %v3455_v57  ;;  %v3491_v56 = vld [vmem:[#allocation4 + $0x680] ss:$16 sps:$4 sm:$0xff]   ;;  %v3496_v57 = vld [vmem:[#allocation4 + $0x464] ss:$16 sps:$4 sm:$0xff]  }
  0xa2   :  { %2284 = vmatprep.subr.bf16.mxu0 %v3460_v58  ;;  %2327 = vmatprep.subr.bf16.mxu1 %v3463_v59  ;;  %v3499_v58 = vld [vmem:[#allocation4 + $0x664] ss:$16 sps:$4 sm:$0xff]   ;;  %v3494_v59 = vld [vmem:[#allocation4 + $0x460] ss:$16 sps:$4 sm:$0xff]  }
  0xa5   :  { %2285 = vmatpush2.bf16.msra.mxu0 %v3458_v60  ;;  %2328 = vmatpush2.bf16.msra.mxu1 %v3461_v61  ;;  %v158_v60 = vsub.s32 5, %v3926_v7  ;;  %v3497_v61 = vld [vmem:[#allocation4 + $0x660] ss:$16 sps:$4 sm:$0xff]  }
  0xa6   :  { %2286 = vmatprep.subr.bf16.mxu0 %v3466_v62  ;;  %2329 = vmatprep.subr.bf16.mxu1 %v3469_v63  ;;  %v3502_v62 = vld [vmem:[#allocation4 + $0x444] ss:$16 sps:$4 sm:$0xff]   ;;  %v166_v63 = vsub.s32 7, %v3926_v7 }
  0xa9   :  { %2287 = vmatpush2.bf16.msra.mxu0 %v3464_v1  ;;  %2330 = vmatpush2.bf16.msra.mxu1 %v3467_v2  ;;  %v3505_v1 = vld [vmem:[#allocation4 + $0x644] ss:$16 sps:$4 sm:$0xff]   ;;  %v3500_v2 = vld [vmem:[#allocation4 + $0x440] ss:$16 sps:$4 sm:$0xff]  }
  0xaa   :  { %2342 = vmatprep.subr.bf16.mxu0 %v3472_v3  ;;  %2385 = vmatprep.subr.bf16.mxu1 %v3475_v4  ;;  %v159_v3 = vrot.slane %v3934_v11, %v158_v60  ;;  %v3503_v4 = vld [vmem:[#allocation4 + $0x640] ss:$16 sps:$4 sm:$0xff]   ;;  %v154_v60 = vsub.s32 4, %v3926_v7 }
 0x10c   :  { %v536_v13 = vpop.f32.mrf.mxu0  ;;  %v579_v14 = vpop.f32.mrf.mxu1 }
 0x10d   :  { %v537_v24 = vadd.f32 %v536_v13, %v139_v16  ;;  %v580_v28 = vadd.f32 %v579_v14, %v147_v19  ;;  %v167_v14 = vrot.slane %v3934_v11, %v166_v63  ;;  %v162_v63 = vsub.s32 6, %v3926_v7 }
 0x10e   :  { %v538_v17 = vpop.f32.mrf.mxu0  ;;  %v581_v20 = vpop.f32.mrf.mxu1 }
 0x10f   :  { %v539_v6 = vadd.f32 %v538_v17, %v143_v15  ;;  %v582_v25 = vadd.f32 %v581_v20, %v151_v18  ;;  %v674_v36 = vmax.f32 %v537_v24, 0.0  ;;  %v676_v39 = vmax.f32 %v580_v28, 0.0  ;;  %v3517_v24 = vld [vmem:[#allocation4 + $0x604] ss:$16 sps:$4 sm:$0xff]  }
 0x110   :  { %v540_v21 = vpop.f32.mrf.mxu0  ;;  %v583_v23 = vpop.f32.mrf.mxu1 }
 0x111   :  { %v541_v22 = vadd.f32 %v540_v21, %v139_v16  ;;  %v584_v26 = vadd.f32 %v583_v23, %v147_v19  ;;  %v675_v33 = vmax.f32 %v539_v6, 0.0  ;;  %v677_v37 = vmax.f32 %v582_v25, 0.0  ;;  %v3509_v21 = vld [vmem:[#allocation4 + $0x620] ss:$16 sps:$4 sm:$0xff]   ;;  %v3514_v6 = vld [vmem:[#allocation4 + $0x404] ss:$16 sps:$4 sm:$0xff]  }
 0x112   :  { %v542_v27 = vpop.f32.mrf.mxu0  ;;  %v585_v30 = vpop.f32.mrf.mxu1 }
 0x113   :  { %v543_v29 = vadd.f32 %v542_v27, %v143_v15  ;;  %v682_v31 = vmax.f32 %v541_v22, 0.0  ;;  %v586_v32 = vadd.f32 %v585_v30, %v151_v18  ;;  %v684_v34 = vmax.f32 %v584_v26, 0.0  ;;  %v3511_v15 = vld [vmem:[#allocation4 + $0x624] ss:$16 sps:$4 sm:$0xff]   ;;  %v3506_v18 = vld [vmem:[#allocation4 + $0x420] ss:$16 sps:$4 sm:$0xff]  }
 0x114   :  { %v3512_v27 = vld [vmem:[#allocation4 + $0x400] ss:$16 sps:$4 sm:$0xff]  }
 0x115   :  { %v683_v35 = vmax.f32 %v543_v29, 0.0  ;;  %v685_v38 = vmax.f32 %v586_v32, 0.0  ;;  %v3951_v41 = vpack.c.bf16 %v682_v31, %v674_v36  ;;  %v3955_v45 = vpack.c.bf16 %v684_v34, %v676_v39  ;;  %v3515_v31 = vld [vmem:[#allocation4 + $0x600] ss:$16 sps:$4 sm:$0xff]   ;;  %v3520_v32 = vld [vmem:[#allocation4 + $0x5e4] ss:$16 sps:$4 sm:$0xff]  }
 0x117   :  { %v3949_v40 = vpack.c.bf16 %v683_v35, %v675_v33  ;;  %v3953_v42 = vpack.c.bf16 %v685_v38, %v677_v37  ;;  %v3523_v35 = vld [vmem:[#allocation4 + $0x7e4] ss:$16 sps:$4 sm:$0xff]   ;;  %v3518_v38 = vld [vmem:[#allocation4 + $0x5e0] ss:$16 sps:$4 sm:$0xff]  }
 0x119   :  { %2288 = vmatprep.mubr.bf16.mxu0 %v3949_v40  ;;  %2331 = vmatprep.mubr.bf16.mxu1 %v3953_v42 }
 0x11a   :  { %2289 = vmatmul.mubr.bf16.vlgmr.msra.gmra.mxu0 %v3951_v41  ;;  %2332 = vmatmul.mubr.bf16.vlgmr.msra.gmra.mxu1 %v3955_v45 }
 0x11b   :  { %2343 = vmatpush1.bf16.msra.mxu0 %v3470_v0  ;;  %2386 = vmatpush1.bf16.msra.mxu1 %v3473_v43  ;;  %v3521_v0 = vld [vmem:[#allocation4 + $0x7e0] ss:$16 sps:$4 sm:$0xff]   ;;  %v3526_v43 = vld [vmem:[#allocation4 + $0x5c4] ss:$16 sps:$4 sm:$0xff]  }
 0x11c   :  { %2344 = vmatprep.subr.bf16.mxu0 %v3478_v44  ;;  %2387 = vmatprep.subr.bf16.mxu1 %v3481_v46  ;;  %v3529_v46 = vld [vmem:[#allocation4 + $0x7c4] ss:$16 sps:$4 sm:$0xff]  }
 0x11f   :  { %2345 = vmatpush1.bf16.msra.mxu0 %v3476_v47  ;;  %2388 = vmatpush1.bf16.msra.mxu1 %v3479_v48  ;;  %v3524_v47 = vld [vmem:[#allocation4 + $0x5c0] ss:$16 sps:$4 sm:$0xff]  }
 0x120   :  { %2346 = vmatprep.subr.bf16.mxu0 %v3484_v49  ;;  %2389 = vmatprep.subr.bf16.mxu1 %v3487_v50  ;;  %v3527_v48 = vld [vmem:[#allocation4 + $0x7c0] ss:$16 sps:$4 sm:$0xff]   ;;  %v3532_v49 = vld [vmem:[#allocation4 + $0x5a4] ss:$16 sps:$4 sm:$0xff]  }
 0x121   :  { %v3535_v50 = vld [vmem:[#allocation4 + $0x7a4] ss:$16 sps:$4 sm:$0xff]  }
 0x123   :  { %2347 = vmatpush1.bf16.msra.mxu0 %v3482_v51  ;;  %2390 = vmatpush1.bf16.msra.mxu1 %v3485_v52  ;;  %v3530_v51 = vld [vmem:[#allocation4 + $0x5a0] ss:$16 sps:$4 sm:$0xff]  }
 0x124   :  { %2348 = vmatprep.subr.bf16.mxu0 %v3490_v53  ;;  %2391 = vmatprep.subr.bf16.mxu1 %v3493_v54  ;;  %v3533_v52 = vld [vmem:[#allocation4 + $0x7a0] ss:$16 sps:$4 sm:$0xff]   ;;  %v3538_v53 = vld [vmem:[#allocation4 + $0x584] ss:$16 sps:$4 sm:$0xff]  }
 0x125   :  { %v3541_v54 = vld [vmem:[#allocation4 + $0x784] ss:$16 sps:$4 sm:$0xff]  }
 0x127   :  { %2349 = vmatpush1.bf16.msra.mxu0 %v3488_v55  ;;  %2392 = vmatpush1.bf16.msra.mxu1 %v3491_v56  ;;  %v3536_v55 = vld [vmem:[#allocation4 + $0x580] ss:$16 sps:$4 sm:$0xff]  }
 0x128   :  { %2350 = vmatprep.subr.bf16.mxu0 %v3496_v57  ;;  %2393 = vmatprep.subr.bf16.mxu1 %v3499_v58  ;;  %v3539_v56 = vld [vmem:[#allocation4 + $0x780] ss:$16 sps:$4 sm:$0xff]   ;;  %v3544_v57 = vld [vmem:[#allocation4 + $0x564] ss:$16 sps:$4 sm:$0xff]  }
 0x129   :  { %v3547_v58 = vld [vmem:[#allocation4 + $0x764] ss:$16 sps:$4 sm:$0xff]  }
 0x12b   :  { %2351 = vmatpush1.bf16.msra.mxu0 %v3494_v59  ;;  %2394 = vmatpush1.bf16.msra.mxu1 %v3497_v61  ;;  %v3542_v59 = vld [vmem:[#allocation4 + $0x560] ss:$16 sps:$4 sm:$0xff]  }
 0x12c   :  { %2352 = vmatprep.subr.bf16.mxu0 %v3502_v62  ;;  %v3964_v13 = vpop.f32.mrf.mxu0  ;;  %2395 = vmatprep.subr.bf16.mxu1 %v3505_v1  ;;  %v3967_v16 = vpop.f32.mrf.mxu1  ;;  %v3545_v61 = vld [vmem:[#allocation4 + $0x760] ss:$16 sps:$4 sm:$0xff]   ;;  %v3550_v62 = vld [vmem:[#allocation4 + $0x544] ss:$16 sps:$4 sm:$0xff]  }
 0x12d   :  { %v3553_v1 = vld [vmem:[#allocation4 + $0x744] ss:$16 sps:$4 sm:$0xff]  }
 0x12e   :  { %v624_v17 = vpop.f32.mrf.mxu0  ;;  %v667_v20 = vpop.f32.mrf.mxu1 }
 0x12f   :  { %2353 = vmatpush1.bf16.msra.mxu0 %v3500_v2  ;;  %v625_v19 = vadd.f32 %v624_v17, %v159_v3  ;;  %2396 = vmatpush1.bf16.msra.mxu1 %v3503_v4  ;;  %v668_v23 = vadd.f32 %v667_v20, %v167_v14  ;;  %v3548_v2 = vld [vmem:[#allocation4 + $0x540] ss:$16 sps:$4 sm:$0xff]  }
 0x130   :  { %2354 = vmatprep.subr.bf16.mxu0 %v3508_v5  ;;  %v3969_v22 = vpop.f32.mrf.mxu0  ;;  %2397 = vmatprep.subr.bf16.mxu1 %v3511_v15  ;;  %v3971_v25 = vpop.f32.mrf.mxu1  ;;  %v3551_v4 = vld [vmem:[#allocation4 + $0x740] ss:$16 sps:$4 sm:$0xff]   ;;  %v3556_v5 = vld [vmem:[#allocation4 + $0x524] ss:$16 sps:$4 sm:$0xff]  }
 0x131   :  { %v679_v28 = vmax.f32 %v625_v19, 0.0  ;;  %v681_v33 = vmax.f32 %v668_v23, 0.0  ;;  %v3559_v15 = vld [vmem:[#allocation4 + $0x724] ss:$16 sps:$4 sm:$0xff]   ;;  %v3554_v17 = vld [vmem:[#allocation4 + $0x520] ss:$16 sps:$4 sm:$0xff]  }
 0x132   :  { %v628_v26 = vpop.f32.mrf.mxu0  ;;  %v671_v30 = vpop.f32.mrf.mxu1  ;;  %v3557_v20 = vld [vmem:[#allocation4 + $0x720] ss:$16 sps:$4 sm:$0xff]  }
 0x133   :  { %2355 = vmatpush1.bf16.msra.mxu0 %v3506_v18  ;;  %v629_v29 = vadd.f32 %v628_v26, %v159_v3  ;;  %2398 = vmatpush1.bf16.msra.mxu1 %v3509_v21  ;;  %v672_v34 = vadd.f32 %v671_v30, %v167_v14  ;;  %v155_v3 = vrot.slane %v3934_v11, %v154_v60  ;;  %v3562_v21 = vld [vmem:[#allocation4 + $0x504] ss:$16 sps:$4 sm:$0xff]   ;;  %v3571_v30 = vld [vmem:[#allocation4 + $0x2ec] ss:$16 sps:$4 sm:$0xff]  }
 0x134   :  { %2356 = vmatprep.subr.bf16.mxu0 %v3514_v6  ;;  %2399 = vmatprep.subr.bf16.mxu1 %v3517_v24  ;;  %v163_v14 = vrot.slane %v3934_v11, %v162_v63  ;;  %v3565_v24 = vld [vmem:[#allocation4 + $0x704] ss:$16 sps:$4 sm:$0xff]   ;;  %v3560_v11 = vld [vmem:[#allocation4 + $0x500] ss:$16 sps:$4 sm:$0xff]   ;;  %v3610_v60 = vld [vmem:[#allocation4 + $0xc] ss:$16 sps:$4 sm:$0xff]  }
 0x135   :  { %v687_v36 = vmax.f32 %v629_v29, 0.0  ;;  %v689_v37 = vmax.f32 %v672_v34, 0.0  ;;  %v623_v18 = vadd.f32 %v3964_v13, %v155_v3  ;;  %v627_v19 = vadd.f32 %v3969_v22, %v155_v3  ;;  %v3568_v13 = vld [vmem:[#allocation4 + $0xec] ss:$16 sps:$4 sm:$0xff]   ;;  %v3611_v63 = vld [vmem:[#allocation4 + $0x208] ss:$16 sps:$4 sm:$0xff]  }
 0x136   :  { %v666_v6 = vadd.f32 %v3967_v16, %v163_v14  ;;  %v670_v23 = vadd.f32 %v3971_v25, %v163_v14  ;;  %v3569_v16 = vld [vmem:[#allocation4 + $0x2e8] ss:$16 sps:$4 sm:$0xff]   ;;  %v3577_v34 = vld [vmem:[#allocation4 + $0x2cc] ss:$16 sps:$4 sm:$0xff]  }
 0x137   :  { %2357 = vmatpush1.bf16.msra.mxu0 %v3512_v27  ;;  %v3973_v39 = vpack.c.bf16 %v687_v36, %v679_v28  ;;  %2400 = vmatpush1.bf16.msra.mxu1 %v3515_v31  ;;  %v3975_v44 = vpack.c.bf16 %v689_v37, %v681_v33  ;;  %v678_v26 = vmax.f32 %v623_v18, 0.0  ;;  %v686_v27 = vmax.f32 %v627_v19, 0.0  ;;  %v3563_v28 = vld [vmem:[#allocation4 + $0x700] ss:$16 sps:$4 sm:$0xff]   ;;  %v3566_v31 = vld [vmem:[#allocation4 + $0xe8] ss:$16 sps:$4 sm:$0xff]  }
 0x138   :  { %2358 = vmatprep.subr.bf16.mxu0 %v3520_v32  ;;  %2401 = vmatprep.subr.bf16.mxu1 %v3523_v35  ;;  %v680_v29 = vmax.f32 %v666_v6, 0.0  ;;  %v688_v22 = vmax.f32 %v670_v23, 0.0  ;;  %v3574_v33 = vld [vmem:[#allocation4 + $0xcc] ss:$16 sps:$4 sm:$0xff]   ;;  %v3572_v35 = vld [vmem:[#allocation4 + $0xc8] ss:$16 sps:$4 sm:$0xff]  }
 0x139   :  { %2374 = vmatprep.mubr.bf16.mxu0 %v3973_v39  ;;  %2417 = vmatprep.mubr.bf16.mxu1 %v3975_v44  ;;  %v3987_v32 = vpack.c.bf16 %v686_v27, %v678_v26  ;;  %v3575_v36 = vld [vmem:[#allocation4 + $0x2c8] ss:$16 sps:$4 sm:$0xff]   ;;  %v3580_v37 = vld [vmem:[#allocation4 + $0xac] ss:$16 sps:$4 sm:$0xff]  }
 0x13a   :  { %v3989_v25 = vpack.c.bf16 %v688_v22, %v680_v29  ;;  %v3614_v3 = vld [vmem:[#allocation4 + $0x1e8] ss:$16 sps:$4 sm:$0xff]   ;;  %v3625_v14 = vld [vmem:[#allocation4 + $0x3cc] ss:$16 sps:$4 sm:$0xff]  }
 0x13b   :  { %2359 = vmatpush2.bf16.msra.mxu0 %v3518_v38  ;;  %2402 = vmatpush2.bf16.msra.mxu1 %v3521_v0  ;;  %v3583_v38 = vld [vmem:[#allocation4 + $0x2ac] ss:$16 sps:$4 sm:$0xff]   ;;  %v3578_v0 = vld [vmem:[#allocation4 + $0xa8] ss:$16 sps:$4 sm:$0xff]  }
 0x13c   :  { %2360 = vmatprep.subr.bf16.mxu0 %v3526_v43  ;;  %2403 = vmatprep.subr.bf16.mxu1 %v3529_v46  ;;  %v3581_v43 = vld [vmem:[#allocation4 + $0x2a8] ss:$16 sps:$4 sm:$0xff]   ;;  %v3586_v46 = vld [vmem:[#allocation4 + $0x8c] ss:$16 sps:$4 sm:$0xff]  }
 0x13d   :  { %v3628_v18 = vld [vmem:[#allocation4 + $0x1ac] ss:$16 sps:$4 sm:$0xff]  }
 0x13e   :  { %v3631_v19 = vld [vmem:[#allocation4 + $0x3ac] ss:$16 sps:$4 sm:$0xff]  }
 0x13f   :  { %2361 = vmatpush2.bf16.msra.mxu0 %v3524_v47  ;;  %2404 = vmatpush2.bf16.msra.mxu1 %v3527_v48  ;;  %v3589_v47 = vld [vmem:[#allocation4 + $0x28c] ss:$16 sps:$4 sm:$0xff]   ;;  %v3584_v48 = vld [vmem:[#allocation4 + $0x88] ss:$16 sps:$4 sm:$0xff]  }
 0x140   :  { %2362 = vmatprep.subr.bf16.mxu0 %v3532_v49  ;;  %2405 = vmatprep.subr.bf16.mxu1 %v3535_v50  ;;  %v3592_v49 = vld [vmem:[#allocation4 + $0x6c] ss:$16 sps:$4 sm:$0xff]  }
 0x141   :  { %v3595_v50 = vld [vmem:[#allocation4 + $0x26c] ss:$16 sps:$4 sm:$0xff]  }
 0x142   :  { %v3634_v6 = vld [vmem:[#allocation4 + $0x18c] ss:$16 sps:$4 sm:$0xff]  }
 0x143   :  { %2363 = vmatpush2.bf16.msra.mxu0 %v3530_v51  ;;  %2406 = vmatpush2.bf16.msra.mxu1 %v3533_v52  ;;  %v3593_v51 = vld [vmem:[#allocation4 + $0x268] ss:$16 sps:$4 sm:$0xff]   ;;  %v3598_v52 = vld [vmem:[#allocation4 + $0x4c] ss:$16 sps:$4 sm:$0xff]  }
 0x144   :  { %2364 = vmatprep.subr.bf16.mxu0 %v3538_v53  ;;  %2407 = vmatprep.subr.bf16.mxu1 %v3541_v54  ;;  %v3601_v53 = vld [vmem:[#allocation4 + $0x24c] ss:$16 sps:$4 sm:$0xff]   ;;  %v3596_v54 = vld [vmem:[#allocation4 + $0x48] ss:$16 sps:$4 sm:$0xff]  }
 0x145   :  { %v3637_v23 = vld [vmem:[#allocation4 + $0x38c] ss:$16 sps:$4 sm:$0xff]  }
 0x146   :  { %v3640_v26 = vld [vmem:[#allocation4 + $0x16c] ss:$16 sps:$4 sm:$0xff]  }
 0x147   :  { %2365 = vmatpush2.bf16.msra.mxu0 %v3536_v55  ;;  %2408 = vmatpush2.bf16.msra.mxu1 %v3539_v56  ;;  %v3599_v55 = vld [vmem:[#allocation4 + $0x248] ss:$16 sps:$4 sm:$0xff]   ;;  %v3604_v56 = vld [vmem:[#allocation4 + $0x2c] ss:$16 sps:$4 sm:$0xff]  }
 0x148   :  { %2366 = vmatprep.subr.bf16.mxu0 %v3544_v57  ;;  %2409 = vmatprep.subr.bf16.mxu1 %v3547_v58  ;;  %v3607_v57 = vld [vmem:[#allocation4 + $0x22c] ss:$16 sps:$4 sm:$0xff]   ;;  %v3602_v58 = vld [vmem:[#allocation4 + $0x28] ss:$16 sps:$4 sm:$0xff]  }
 0x149   :  { %v3643_v27 = vld [vmem:[#allocation4 + $0x36c] ss:$16 sps:$4 sm:$0xff]  }
 0x14a   :  { %v3646_v29 = vld [vmem:[#allocation4 + $0x14c] ss:$16 sps:$4 sm:$0xff]  }
 0x14b   :  { %2367 = vmatpush2.bf16.msra.mxu0 %v3542_v59  ;;  %2410 = vmatpush2.bf16.msra.mxu1 %v3545_v61  ;;  %v3605_v59 = vld [vmem:[#allocation4 + $0x228] ss:$16 sps:$4 sm:$0xff]   ;;  %v3613_v61 = vld [vmem:[#allocation4 + $0x20c] ss:$16 sps:$4 sm:$0xff]  }
 0x14c   :  { %2368 = vmatprep.subr.bf16.mxu0 %v3550_v62  ;;  %2411 = vmatprep.subr.bf16.mxu1 %v3553_v1  ;;  %v3608_v62 = vld [vmem:[#allocation4 + $0x8] ss:$16 sps:$4 sm:$0xff]   ;;  %v3616_v1 = vld [vmem:[#allocation4 + $0x1ec] ss:$16 sps:$4 sm:$0xff]  }
 0x14d   :  { %v3649_v22 = vld [vmem:[#allocation4 + $0x34c] ss:$16 sps:$4 sm:$0xff]  }
 0x14f   :  { %2369 = vmatpush2.bf16.msra.mxu0 %v3548_v2  ;;  %2412 = vmatpush2.bf16.msra.mxu1 %v3551_v4  ;;  %v3619_v2 = vld [vmem:[#allocation4 + $0x3ec] ss:$16 sps:$4 sm:$0xff]   ;;  %v3617_v4 = vld [vmem:[#allocation4 + $0x3e8] ss:$16 sps:$4 sm:$0xff]  }
 0x150   :  { %2370 = vmatprep.subr.bf16.mxu0 %v3556_v5  ;;  %2413 = vmatprep.subr.bf16.mxu1 %v3559_v15  ;;  %v3622_v5 = vld [vmem:[#allocation4 + $0x1cc] ss:$16 sps:$4 sm:$0xff]   ;;  %v3620_v15 = vld [vmem:[#allocation4 + $0x1c8] ss:$16 sps:$4 sm:$0xff]  }
 0x153   :  { %2371 = vmatpush2.bf16.msra.mxu0 %v3554_v17  ;;  %2414 = vmatpush2.bf16.msra.mxu1 %v3557_v20  ;;  %v3623_v17 = vld [vmem:[#allocation4 + $0x3c8] ss:$16 sps:$4 sm:$0xff]  }
 0x154   :  { %2372 = vmatprep.subr.bf16.mxu0 %v3562_v21  ;;  %2415 = vmatprep.subr.bf16.mxu1 %v3565_v24  ;;  %v3626_v20 = vld [vmem:[#allocation4 + $0x1a8] ss:$16 sps:$4 sm:$0xff]  }
 0x155   :  { %v3629_v21 = vld [vmem:[#allocation4 + $0x3a8] ss:$16 sps:$4 sm:$0xff]  }
 0x156   :  { %v3632_v24 = vld [vmem:[#allocation4 + $0x188] ss:$16 sps:$4 sm:$0xff]  }
 0x157   :  { %2373 = vmatpush2.bf16.msra.mxu0 %v3560_v11  ;;  %2416 = vmatpush2.bf16.msra.mxu1 %v3563_v28  ;;  %v3635_v11 = vld [vmem:[#allocation4 + $0x388] ss:$16 sps:$4 sm:$0xff]  }
 0x158   :  { %2428 = vmatprep.subr.bf16.mxu0 %v3568_v13  ;;  %2471 = vmatprep.subr.bf16.mxu1 %v3571_v30  ;;  %v3638_v28 = vld [vmem:[#allocation4 + $0x168] ss:$16 sps:$4 sm:$0xff]  }
 0x159   :  { %v3641_v13 = vld [vmem:[#allocation4 + $0x368] ss:$16 sps:$4 sm:$0xff]  }
 0x15a   :  { %2375 = vmatmul.mubr.bf16.vlgmr.msra.gmra.mxu0 %v3987_v32  ;;  %2418 = vmatmul.mubr.bf16.vlgmr.msra.gmra.mxu1 %v3989_v25  ;;  %v3644_v30 = vld [vmem:[#allocation4 + $0x148] ss:$16 sps:$4 sm:$0xff]  }
 0x15b   :  { %2429 = vmatpush1.bf16.msra.mxu0 %v3566_v31  ;;  %2460 = vmatprep.mubr.bf16.mxu0 %v3949_v40  ;;  %v3587_v40 = vld [vmem:[#allocation4 + $0x288] ss:$16 sps:$4 sm:$0xff]  }
 0x15c   :  { %2472 = vmatpush1.bf16.msra.mxu1 %v3569_v16  ;;  %2503 = vmatprep.mubr.bf16.mxu1 %v3953_v42  ;;  %v3590_v42 = vld [vmem:[#allocation4 + $0x68] ss:$16 sps:$4 sm:$0xff]   ;;  %v3652_v16 = vld [vmem:[#allocation4 + $0x12c] ss:$16 sps:$4 sm:$0xff]  }
 0x15d   :  { %2430 = vmatprep.subr.bf16.mxu0 %v3574_v33  ;;  %2473 = vmatprep.subr.bf16.mxu1 %v3577_v34  ;;  %v3647_v31 = vld [vmem:[#allocation4 + $0x348] ss:$16 sps:$4 sm:$0xff]   ;;  %v3655_v33 = vld [vmem:[#allocation4 + $0x32c] ss:$16 sps:$4 sm:$0xff]  }
 0x15e   :  { %v3650_v34 = vld [vmem:[#allocation4 + $0x128] ss:$16 sps:$4 sm:$0xff]  }
 0x15f   :  { %2431 = vmatpush1.bf16.msra.mxu0 %v3572_v35  ;;  %v3653_v35 = vld [vmem:[#allocation4 + $0x328] ss:$16 sps:$4 sm:$0xff]  }
 0x160   :  { %2474 = vmatpush1.bf16.msra.mxu1 %v3575_v36  ;;  %2432 = vmatprep.subr.bf16.mxu0 %v3580_v37  ;;  %v3658_v36 = vld [vmem:[#allocation4 + $0x10c] ss:$16 sps:$4 sm:$0xff]  }
 0x161   :  { %2475 = vmatprep.subr.bf16.mxu1 %v3583_v38  ;;  %v3661_v37 = vld [vmem:[#allocation4 + $0x30c] ss:$16 sps:$4 sm:$0xff]   ;;  %v3656_v38 = vld [vmem:[#allocation4 + $0x108] ss:$16 sps:$4 sm:$0xff]  }
 0x163   :  { %2433 = vmatpush1.bf16.msra.mxu0 %v3578_v0  ;;  %v3659_v0 = vld [vmem:[#allocation4 + $0x308] ss:$16 sps:$4 sm:$0xff]  }
 0x164   :  { %2476 = vmatpush1.bf16.msra.mxu1 %v3581_v43  ;;  %2434 = vmatprep.subr.bf16.mxu0 %v3586_v46  ;;  %v3664_v43 = vld [vmem:[#allocation4 + $0x4ec] ss:$16 sps:$4 sm:$0xff]  }
 0x165   :  { %2477 = vmatprep.subr.bf16.mxu1 %v3589_v47  ;;  %v3667_v46 = vld [vmem:[#allocation4 + $0x6ec] ss:$16 sps:$4 sm:$0xff]   ;;  %v3662_v47 = vld [vmem:[#allocation4 + $0x4e8] ss:$16 sps:$4 sm:$0xff]  }
 0x167   :  { %2435 = vmatpush1.bf16.msra.mxu0 %v3584_v48  ;;  %v3665_v48 = vld [vmem:[#allocation4 + $0x6e8] ss:$16 sps:$4 sm:$0xff]  }
 0x168   :  { %2478 = vmatpush1.bf16.msra.mxu1 %v3587_v40  ;;  %2436 = vmatprep.subr.bf16.mxu0 %v3592_v49  ;;  %v3670_v40 = vld [vmem:[#allocation4 + $0x4cc] ss:$16 sps:$4 sm:$0xff]  }
 0x169   :  { %2479 = vmatprep.subr.bf16.mxu1 %v3595_v50  ;;  %v3673_v49 = vld [vmem:[#allocation4 + $0x6cc] ss:$16 sps:$4 sm:$0xff]   ;;  %v3668_v50 = vld [vmem:[#allocation4 + $0x4c8] ss:$16 sps:$4 sm:$0xff]  }
 0x16b   :  { %2437 = vmatpush1.bf16.msra.mxu0 %v3590_v42  ;;  %v3671_v42 = vld [vmem:[#allocation4 + $0x6c8] ss:$16 sps:$4 sm:$0xff]  }
 0x16c   :  { %2480 = vmatpush1.bf16.msra.mxu1 %v3593_v51  ;;  %2438 = vmatprep.subr.bf16.mxu0 %v3598_v52  ;;  %v3676_v51 = vld [vmem:[#allocation4 + $0x4ac] ss:$16 sps:$4 sm:$0xff]  }
 0x16d   :  { %2481 = vmatprep.subr.bf16.mxu1 %v3601_v53  ;;  %v3679_v52 = vld [vmem:[#allocation4 + $0x6ac] ss:$16 sps:$4 sm:$0xff]   ;;  %v3674_v53 = vld [vmem:[#allocation4 + $0x4a8] ss:$16 sps:$4 sm:$0xff]  }
 0x16f   :  { %2439 = vmatpush1.bf16.msra.mxu0 %v3596_v54  ;;  %v3682_v54 = vld [vmem:[#allocation4 + $0x48c] ss:$16 sps:$4 sm:$0xff]  }
 0x170   :  { %2482 = vmatpush1.bf16.msra.mxu1 %v3599_v55  ;;  %2440 = vmatprep.subr.bf16.mxu0 %v3604_v56  ;;  %v3680_v55 = vld [vmem:[#allocation4 + $0x488] ss:$16 sps:$4 sm:$0xff]   ;;  %v3688_v56 = vld [vmem:[#allocation4 + $0x46c] ss:$16 sps:$4 sm:$0xff]  }
 0x171   :  { %2483 = vmatprep.subr.bf16.mxu1 %v3607_v57  ;;  %v3691_v57 = vld [vmem:[#allocation4 + $0x66c] ss:$16 sps:$4 sm:$0xff]  }
 0x173   :  { %2441 = vmatpush1.bf16.msra.mxu0 %v3602_v58  ;;  %v3689_v58 = vld [vmem:[#allocation4 + $0x668] ss:$16 sps:$4 sm:$0xff]  }
 0x174   :  { %2484 = vmatpush1.bf16.msra.mxu1 %v3605_v59  ;;  %2442 = vmatprep.subr.bf16.mxu0 %v3610_v60  ;;  %v3694_v59 = vld [vmem:[#allocation4 + $0x44c] ss:$16 sps:$4 sm:$0xff]  }
 0x175   :  { %2485 = vmatprep.subr.bf16.mxu1 %v3613_v61  ;;  %v3697_v60 = vld [vmem:[#allocation4 + $0x64c] ss:$16 sps:$4 sm:$0xff]   ;;  %v3692_v61 = vld [vmem:[#allocation4 + $0x448] ss:$16 sps:$4 sm:$0xff]  }
 0x177   :  { %2443 = vmatpush1.bf16.msra.mxu0 %v3608_v62  ;;  %v3695_v62 = vld [vmem:[#allocation4 + $0x648] ss:$16 sps:$4 sm:$0xff]  }
 0x178   :  { %2486 = vmatpush1.bf16.msra.mxu1 %v3611_v63  ;;  %2444 = vmatprep.subr.bf16.mxu0 %v3616_v1  ;;  %v3700_v63 = vld [vmem:[#allocation4 + $0x42c] ss:$16 sps:$4 sm:$0xff]  }
 0x179   :  { %2487 = vmatprep.subr.bf16.mxu1 %v3619_v2  ;;  %v3703_v1 = vld [vmem:[#allocation4 + $0x62c] ss:$16 sps:$4 sm:$0xff]   ;;  %v3698_v2 = vld [vmem:[#allocation4 + $0x428] ss:$16 sps:$4 sm:$0xff]  }
 0x17b   :  { %2445 = vmatpush2.bf16.msra.mxu0 %v3614_v3  ;;  %v3701_v3 = vld [vmem:[#allocation4 + $0x628] ss:$16 sps:$4 sm:$0xff]  }
 0x17c   :  { %2488 = vmatpush2.bf16.msra.mxu1 %v3617_v4  ;;  %2446 = vmatprep.subr.bf16.mxu0 %v3622_v5  ;;  %v3706_v4 = vld [vmem:[#allocation4 + $0x40c] ss:$16 sps:$4 sm:$0xff]  }
 0x17d   :  { %2489 = vmatprep.subr.bf16.mxu1 %v3625_v14  ;;  %v3709_v5 = vld [vmem:[#allocation4 + $0x60c] ss:$16 sps:$4 sm:$0xff]   ;;  %v3704_v14 = vld [vmem:[#allocation4 + $0x408] ss:$16 sps:$4 sm:$0xff]  }
 0x17f   :  { %2447 = vmatpush2.bf16.msra.mxu0 %v3620_v15  ;;  %v3707_v15 = vld [vmem:[#allocation4 + $0x608] ss:$16 sps:$4 sm:$0xff]  }
 0x180   :  { %2490 = vmatpush2.bf16.msra.mxu1 %v3623_v17  ;;  %2448 = vmatprep.subr.bf16.mxu0 %v3628_v18  ;;  %v3712_v17 = vld [vmem:[#allocation4 + $0x5ec] ss:$16 sps:$4 sm:$0xff]  }
 0x181   :  { %2491 = vmatprep.subr.bf16.mxu1 %v3631_v19  ;;  %v3715_v18 = vld [vmem:[#allocation4 + $0x7ec] ss:$16 sps:$4 sm:$0xff]   ;;  %v3710_v19 = vld [vmem:[#allocation4 + $0x5e8] ss:$16 sps:$4 sm:$0xff]  }
 0x183   :  { %2449 = vmatpush2.bf16.msra.mxu0 %v3626_v20  ;;  %v3713_v20 = vld [vmem:[#allocation4 + $0x7e8] ss:$16 sps:$4 sm:$0xff]  }
 0x184   :  { %2492 = vmatpush2.bf16.msra.mxu1 %v3629_v21  ;;  %2450 = vmatprep.subr.bf16.mxu0 %v3634_v6  ;;  %v3718_v21 = vld [vmem:[#allocation4 + $0x5cc] ss:$16 sps:$4 sm:$0xff]  }
 0x185   :  { %2493 = vmatprep.subr.bf16.mxu1 %v3637_v23  ;;  %v3721_v6 = vld [vmem:[#allocation4 + $0x7cc] ss:$16 sps:$4 sm:$0xff]   ;;  %v3716_v23 = vld [vmem:[#allocation4 + $0x5c8] ss:$16 sps:$4 sm:$0xff]  }
 0x187   :  { %2451 = vmatpush2.bf16.msra.mxu0 %v3632_v24  ;;  %v3719_v24 = vld [vmem:[#allocation4 + $0x7c8] ss:$16 sps:$4 sm:$0xff]  }
 0x188   :  { %2494 = vmatpush2.bf16.msra.mxu1 %v3635_v11  ;;  %2452 = vmatprep.subr.bf16.mxu0 %v3640_v26  ;;  %v3724_v11 = vld [vmem:[#allocation4 + $0x5ac] ss:$16 sps:$4 sm:$0xff]  }
 0x189   :  { %2495 = vmatprep.subr.bf16.mxu1 %v3643_v27  ;;  %v3727_v26 = vld [vmem:[#allocation4 + $0x7ac] ss:$16 sps:$4 sm:$0xff]   ;;  %v3722_v27 = vld [vmem:[#allocation4 + $0x5a8] ss:$16 sps:$4 sm:$0xff]  }
 0x18b   :  { %2453 = vmatpush2.bf16.msra.mxu0 %v3638_v28  ;;  %v3725_v28 = vld [vmem:[#allocation4 + $0x7a8] ss:$16 sps:$4 sm:$0xff]  }
 0x18c   :  { %2496 = vmatpush2.bf16.msra.mxu1 %v3641_v13  ;;  %2454 = vmatprep.subr.bf16.mxu0 %v3646_v29  ;;  %v3730_v13 = vld [vmem:[#allocation4 + $0x58c] ss:$16 sps:$4 sm:$0xff]  }
 0x18d   :  { %2497 = vmatprep.subr.bf16.mxu1 %v3649_v22  ;;  %v3733_v29 = vld [vmem:[#allocation4 + $0x78c] ss:$16 sps:$4 sm:$0xff]   ;;  %v3728_v22 = vld [vmem:[#allocation4 + $0x588] ss:$16 sps:$4 sm:$0xff]  }
 0x18f   :  { %2455 = vmatpush2.bf16.msra.mxu0 %v3644_v30  ;;  %v3731_v30 = vld [vmem:[#allocation4 + $0x788] ss:$16 sps:$4 sm:$0xff]  }
 0x190   :  { %2498 = vmatpush2.bf16.msra.mxu1 %v3647_v31  ;;  %2456 = vmatprep.subr.bf16.mxu0 %v3652_v16  ;;  %v3736_v31 = vld [vmem:[#allocation4 + $0x56c] ss:$16 sps:$4 sm:$0xff]  }
 0x191   :  { %2499 = vmatprep.subr.bf16.mxu1 %v3655_v33  ;;  %v3739_v16 = vld [vmem:[#allocation4 + $0x76c] ss:$16 sps:$4 sm:$0xff]   ;;  %v3734_v33 = vld [vmem:[#allocation4 + $0x568] ss:$16 sps:$4 sm:$0xff]  }
 0x193   :  { %2457 = vmatpush2.bf16.msra.mxu0 %v3650_v34  ;;  %v3737_v34 = vld [vmem:[#allocation4 + $0x768] ss:$16 sps:$4 sm:$0xff]  }
 0x194   :  { %2500 = vmatpush2.bf16.msra.mxu1 %v3653_v35  ;;  %2458 = vmatprep.subr.bf16.mxu0 %v3658_v36  ;;  %v3742_v35 = vld [vmem:[#allocation4 + $0x54c] ss:$16 sps:$4 sm:$0xff]  }
 0x195   :  { %2501 = vmatprep.subr.bf16.mxu1 %v3661_v37  ;;  %v3745_v36 = vld [vmem:[#allocation4 + $0x74c] ss:$16 sps:$4 sm:$0xff]   ;;  %v3740_v37 = vld [vmem:[#allocation4 + $0x548] ss:$16 sps:$4 sm:$0xff]  }
 0x197   :  { %2459 = vmatpush2.bf16.msra.mxu0 %v3656_v38  ;;  %v3743_v38 = vld [vmem:[#allocation4 + $0x748] ss:$16 sps:$4 sm:$0xff]  }
 0x198   :  { %2502 = vmatpush2.bf16.msra.mxu1 %v3659_v0  ;;  %2514 = vmatprep.subr.bf16.mxu0 %v3664_v43  ;;  %v3748_v0 = vld [vmem:[#allocation4 + $0x52c] ss:$16 sps:$4 sm:$0xff]  }
 0x199   :  { %2557 = vmatprep.subr.bf16.mxu1 %v3667_v46  ;;  %v3751_v43 = vld [vmem:[#allocation4 + $0x72c] ss:$16 sps:$4 sm:$0xff]   ;;  %v3746_v46 = vld [vmem:[#allocation4 + $0x528] ss:$16 sps:$4 sm:$0xff]  }
 0x19a   :  { %2461 = vmatmul.mubr.bf16.vlgmr.msra.gmra.mxu0 %v3951_v41  ;;  %v3677_v41 = vld [vmem:[#allocation4 + $0x6a8] ss:$16 sps:$4 sm:$0xff]  }
 0x19b   :  { %2504 = vmatmul.mubr.bf16.vlgmr.msra.gmra.mxu1 %v3955_v45  ;;  %2515 = vmatpush1.bf16.msra.mxu0 %v3662_v47  ;;  %v3685_v45 = vld [vmem:[#allocation4 + $0x68c] ss:$16 sps:$4 sm:$0xff]   ;;  %v3749_v47 = vld [vmem:[#allocation4 + $0x728] ss:$16 sps:$4 sm:$0xff]  }
 0x19c   :  { %2546 = vmatprep.mubr.bf16.mxu0 %v3973_v39  ;;  %2558 = vmatpush1.bf16.msra.mxu1 %v3665_v48  ;;  %v3683_v39 = vld [vmem:[#allocation4 + $0x688] ss:$16 sps:$4 sm:$0xff]   ;;  %v3754_v48 = vld [vmem:[#allocation4 + $0x50c] ss:$16 sps:$4 sm:$0xff]  }
 0x19d   :  { %2589 = vmatprep.mubr.bf16.mxu1 %v3975_v44  ;;  %2516 = vmatprep.subr.bf16.mxu0 %v3670_v40  ;;  %v3686_v44 = vld [vmem:[#allocation4 + $0x468] ss:$16 sps:$4 sm:$0xff]   ;;  %v3757_v40 = vld [vmem:[#allocation4 + $0x70c] ss:$16 sps:$4 sm:$0xff]  }
 0x19e   :  { %2559 = vmatprep.subr.bf16.mxu1 %v3673_v49  ;;  %v3752_v49 = vld [vmem:[#allocation4 + $0x508] ss:$16 sps:$4 sm:$0xff]  }
 0x19f   :  { %2517 = vmatpush1.bf16.msra.mxu0 %v3668_v50  ;;  %v3755_v50 = vld [vmem:[#allocation4 + $0x708] ss:$16 sps:$4 sm:$0xff]  }
 0x1a0   :  { %2560 = vmatpush1.bf16.msra.mxu1 %v3671_v42  ;;  %2518 = vmatprep.subr.bf16.mxu0 %v3676_v51  ;;  %v3758_v42 = vld [vmem:[#allocation6 + $0x78] sm:$0xff]  }
 0x1a1   :  { %2561 = vmatprep.subr.bf16.mxu1 %v3679_v52  ;;  %v3759_v51 = vld [vmem:[#allocation6 + $0x38] sm:$0xff]   ;;  %v3760_v52 = vld [vmem:[#allocation6 + $0x70] sm:$0xff]  }
 0x1a3   :  { %2519 = vmatpush1.bf16.msra.mxu0 %v3674_v53  ;;  %v3761_v53 = vld [vmem:[#allocation6 + $0x30] sm:$0xff]  }
 0x1a4   :  { %2562 = vmatpush1.bf16.msra.mxu1 %v3677_v41  ;;  %2520 = vmatprep.subr.bf16.mxu0 %v3682_v54  ;;  %v3762_v41 = vld [vmem:[#allocation6 + $0x68] sm:$0xff]  }
 0x1a5   :  { %2563 = vmatprep.subr.bf16.mxu1 %v3685_v45  ;;  %v3763_v54 = vld [vmem:[#allocation6 + $0x28] sm:$0xff]   ;;  %v3764_v45 = vld [vmem:[#allocation6 + $0x60] sm:$0xff]  }
 0x1a7   :  { %2521 = vmatpush1.bf16.msra.mxu0 %v3680_v55  ;;  %v3765_v55 = vld [vmem:[#allocation6 + $0x20] sm:$0xff]  }
 0x1a8   :  { %2564 = vmatpush1.bf16.msra.mxu1 %v3683_v39  ;;  %2522 = vmatprep.subr.bf16.mxu0 %v3688_v56  ;;  %v3774_v39 = vld [vmem:[#allocation6 + $0xf8] sm:$0xff]  }
 0x1a9   :  { %2565 = vmatprep.subr.bf16.mxu1 %v3691_v57  ;;  %v3775_v56 = vld [vmem:[#allocation6 + $0xb8] sm:$0xff]   ;;  %v3776_v57 = vld [vmem:[#allocation6 + $0xf0] sm:$0xff]  }
 0x1ab   :  { %2523 = vmatpush1.bf16.msra.mxu0 %v3686_v44  ;;  %v3766_v44 = vld [vmem:[#allocation6 + $0x58] sm:$0xff]  }
 0x1ac   :  { %2566 = vmatpush1.bf16.msra.mxu1 %v3689_v58  ;;  %2524 = vmatprep.subr.bf16.mxu0 %v3694_v59  ;;  %v3778_v58 = vld [vmem:[#allocation6 + $0xe8] sm:$0xff]   ;;  %v3768_v59 = vld [vmem:[#allocation6 + $0x50] sm:$0xff]  }
 0x1ad   :  { %2567 = vmatprep.subr.bf16.mxu1 %v3697_v60  ;;  %v3779_v60 = vld [vmem:[#allocation6 + $0xa8] sm:$0xff]  }
 0x1af   :  { %2525 = vmatpush1.bf16.msra.mxu0 %v3692_v61  ;;  %v3769_v61 = vld [vmem:[#allocation6 + $0x10] sm:$0xff]  }
 0x1b0   :  { %2568 = vmatpush1.bf16.msra.mxu1 %v3695_v62  ;;  %2526 = vmatprep.subr.bf16.mxu0 %v3700_v63  ;;  %v3780_v62 = vld [vmem:[#allocation6 + $0xe0] sm:$0xff]   ;;  %v3770_v63 = vld [vmem:[#allocation6 + $0x48] sm:$0xff]  }
 0x1b1   :  { %2569 = vmatprep.subr.bf16.mxu1 %v3703_v1  ;;  %v3781_v1 = vld [vmem:[#allocation6 + $0xa0] sm:$0xff]  }
 0x1b3   :  { %2527 = vmatpush1.bf16.msra.mxu0 %v3698_v2  ;;  %v3771_v2 = vld [vmem:[#allocation6 + $0x8] sm:$0xff]  }
 0x1b4   :  { %2570 = vmatpush1.bf16.msra.mxu1 %v3701_v3  ;;  %2528 = vmatprep.subr.bf16.mxu0 %v3706_v4  ;;  %v3772_v3 = vld [vmem:[#allocation6 + $0x40] sm:$0xff]  }
 0x1b5   :  { %2571 = vmatprep.subr.bf16.mxu1 %v3709_v5  ;;  %v3773_v4 = vld [vmem:[#allocation6] sm:$0xff]  }
 0x1b7   :  { %2529 = vmatpush1.bf16.msra.mxu0 %v3704_v14 }
 0x1b8   :  { %2572 = vmatpush1.bf16.msra.mxu1 %v3707_v15  ;;  %2530 = vmatprep.subr.bf16.mxu0 %v3712_v17  ;;  %v954_v17 = vld [vmem:[%s4025_s4] sm:$0xf] }
 0x1b9   :  { %2573 = vmatprep.subr.bf16.mxu1 %v3715_v18 }
 0x1bb   :  { %2531 = vmatpush2.bf16.msra.mxu0 %v3710_v19  ;;  %v963_v19 = vrot.slane %v954_v17, %v142_v8 }
 0x1bc   :  { %2574 = vmatpush2.bf16.msra.mxu1 %v3713_v20  ;;  %2532 = vmatprep.subr.bf16.mxu0 %v3718_v21  ;;  %v959_v20 = vrot.slane %v954_v17, %v138_v9 }
 0x1bd   :  { %2575 = vmatprep.subr.bf16.mxu1 %v3721_v6 }
 0x1bf   :  { %2533 = vmatpush2.bf16.msra.mxu0 %v3716_v23 }
 0x1c0   :  { %2576 = vmatpush2.bf16.msra.mxu1 %v3719_v24  ;;  %2534 = vmatprep.subr.bf16.mxu0 %v3724_v11 }
 0x1c1   :  { %2577 = vmatprep.subr.bf16.mxu1 %v3727_v26 }
 0x1c3   :  { %2535 = vmatpush2.bf16.msra.mxu0 %v3722_v27 }
 0x1c4   :  { %2578 = vmatpush2.bf16.msra.mxu1 %v3725_v28  ;;  %2536 = vmatprep.subr.bf16.mxu0 %v3730_v13  ;;  %v3782_v13 = vld [vmem:[#allocation6 + $0xd8] sm:$0xff]  }
 0x1c5   :  { %2579 = vmatprep.subr.bf16.mxu1 %v3733_v29 }
 0x1c7   :  { %2537 = vmatpush2.bf16.msra.mxu0 %v3728_v22 }
 0x1c8   :  { %2580 = vmatpush2.bf16.msra.mxu1 %v3731_v30  ;;  %2538 = vmatprep.subr.bf16.mxu0 %v3736_v31  ;;  %v3783_v31 = vld [vmem:[#allocation6 + $0x98] sm:$0xff]  }
 0x1c9   :  { %2581 = vmatprep.subr.bf16.mxu1 %v3739_v16 }
 0x1cb   :  { %2539 = vmatpush2.bf16.msra.mxu0 %v3734_v33 }
 0x1cc   :  { %2582 = vmatpush2.bf16.msra.mxu1 %v3737_v34  ;;  %2540 = vmatprep.subr.bf16.mxu0 %v3742_v35 }
 0x1cd   :  { %2583 = vmatprep.subr.bf16.mxu1 %v3745_v36 }
 0x1cf   :  { %2541 = vmatpush2.bf16.msra.mxu0 %v3740_v37  ;;  %v3784_v37 = vld [vmem:[#allocation6 + $0xd0] sm:$0xff]  }
 0x1d0   :  { %2584 = vmatpush2.bf16.msra.mxu1 %v3743_v38  ;;  %2542 = vmatprep.subr.bf16.mxu0 %v3748_v0 }
 0x1d1   :  { %2585 = vmatprep.subr.bf16.mxu1 %v3751_v43 }
 0x1d3   :  { %2543 = vmatpush2.bf16.msra.mxu0 %v3746_v46  ;;  %v3785_v46 = vld [vmem:[#allocation6 + $0x90] sm:$0xff]  }
 0x1d4   :  { %2586 = vmatpush2.bf16.msra.mxu1 %v3749_v47  ;;  %2544 = vmatprep.subr.bf16.mxu0 %v3754_v48 }
 0x1d5   :  { %2587 = vmatprep.subr.bf16.mxu1 %v3757_v40 }
 0x1d7   :  { %2545 = vmatpush2.bf16.msra.mxu0 %v3752_v49 }
 0x1d8   :  { %2588 = vmatpush2.bf16.msra.mxu1 %v3755_v50  ;;  %3319 = vmatprep.subr.bf16.mxu0 %v3758_v42 }
 0x1d9   :  { %3341 = vmatprep.subr.bf16.mxu1 %v3774_v39  ;;  %v3788_v39 = vld [vmem:[#allocation6 + $0xc0] sm:$0xff]  }
 0x1da   :  { %2547 = vmatmul.mubr.bf16.vlgmr.msra.gmra.mxu0 %v3987_v32  ;;  %v3777_v32 = vld [vmem:[#allocation6 + $0xb0] sm:$0xff]   ;;  %v2290_v5 = vpop.f32.mrf.mxu0  ;;  %v2333_v14 = vpop.f32.mrf.mxu1 }
 0x1db   :  { %2590 = vmatmul.mubr.bf16.vlgmr.msra.gmra.mxu1 %v3989_v25  ;;  %3320 = vmatpush3.bf16.msra.mxu0 %v3759_v51  ;;  %v3767_v25 = vld [vmem:[#allocation6 + $0x18] sm:$0xff]   ;;  %v2291_v24 = vadd.f32 %v2290_v5, %v959_v20  ;;  %v3786_v51 = vld [vmem:[#allocation6 + $0xc8] sm:$0xff]  }
 0x1dc   :  { %3321 = vmatprep.subr.bf16.mxu0 %v3760_v52  ;;  %3342 = vmatpush3.bf16.msra.mxu1 %v3775_v56  ;;  %v2292_v15 = vpop.f32.mrf.mxu0  ;;  %v2335_v18 = vpop.f32.mrf.mxu1 }
 0x1dd   :  { %3343 = vmatprep.subr.bf16.mxu1 %v3776_v57  ;;  %v2293_v23 = vadd.f32 %v2292_v15, %v963_v19  ;;  %v2334_v16 = vadd.f32 %v2333_v14, %v2291_v24  ;;  %v3789_v57 = vld [vmem:[#allocation6 + $0x80] sm:$0xff]  }
 0x1de   :  { %v2294_v21 = vpop.f32.mrf.mxu0  ;;  %v2337_v6 = vpop.f32.mrf.mxu1 }
 0x1df   :  { %3322 = vmatpush3.bf16.msra.mxu0 %v3761_v53  ;;  %v2295_v26 = vadd.f32 %v2294_v21, %v959_v20  ;;  %v2336_v29 = vadd.f32 %v2335_v18, %v2293_v23  ;;  %v3787_v53 = vld [vmem:[#allocation6 + $0x88] sm:$0xff]  }
 0x1e0   :  { %3323 = vmatprep.subr.bf16.mxu0 %v3762_v41  ;;  %3344 = vmatpush3.bf16.msra.mxu1 %v3777_v32  ;;  %v2296_v11 = vpop.f32.mrf.mxu0  ;;  %v2339_v27 = vpop.f32.mrf.mxu1 }
 0x1e1   :  { %3345 = vmatprep.subr.bf16.mxu1 %v3778_v58  ;;  %v2297_v22 = vadd.f32 %v2296_v11, %v963_v19  ;;  %v2338_v8 = vadd.f32 %v2337_v6, %v2295_v26 }
 0x1e3   :  { %3324 = vmatpush3.bf16.msra.mxu0 %v3763_v54  ;;  %v2340_v38 = vadd.f32 %v2339_v27, %v2297_v22 }
 0x1e4   :  { %3325 = vmatprep.subr.bf16.mxu0 %v3764_v45  ;;  %3346 = vmatpush3.bf16.msra.mxu1 %v3779_v60  ;;  %v971_v60 = vrot.slane %v954_v17, %v150_v10 }
 0x1e5   :  { %3347 = vmatprep.subr.bf16.mxu1 %v3780_v62 }
 0x1e7   :  { %3326 = vmatpush3.bf16.msra.mxu0 %v3765_v55 }
 0x1e8   :  { %3327 = vmatprep.subr.bf16.mxu0 %v3766_v44  ;;  %3348 = vmatpush3.bf16.msra.mxu1 %v3781_v1 }
 0x1e9   :  { %3349 = vmatprep.subr.bf16.mxu1 %v3782_v13 }
 0x1eb   :  { %3328 = vmatpush3.bf16.msra.mxu0 %v3767_v25 }
 0x1ec   :  { %3329 = vmatprep.subr.bf16.mxu0 %v3768_v59  ;;  %3350 = vmatpush3.bf16.msra.mxu1 %v3783_v31 }
 0x1ed   :  { %3351 = vmatprep.subr.bf16.mxu1 %v3784_v37 }
 0x1ef   :  { %3330 = vmatpush3.bf16.msra.mxu0 %v3769_v61  ;;  %v967_v61 = vrot.slane %v954_v17, %v146_v12 }
 0x1f0   :  { %3331 = vmatprep.subr.bf16.mxu0 %v3770_v63  ;;  %3352 = vmatpush3.bf16.msra.mxu1 %v3785_v46 }
 0x1f1   :  { %3353 = vmatprep.subr.bf16.mxu1 %v3786_v51 }
 0x1f3   :  { %3332 = vmatpush3.bf16.msra.mxu0 %v3771_v2 }
 0x1f4   :  { %3333 = vmatprep.subr.bf16.mxu0 %v3772_v3  ;;  %3354 = vmatpush3.bf16.msra.mxu1 %v3787_v53 }
 0x1f5   :  { %3355 = vmatprep.subr.bf16.mxu1 %v3788_v39 }
 0x1f7   :  { %3334 = vmatpush3.bf16.msra.mxu0 %v3773_v4 }
 0x1f8   :  { %3356 = vmatpush3.bf16.msra.mxu1 %v3789_v57 }
 0x21a   :  { %v2376_v28 = vpop.f32.mrf.mxu0  ;;  %v2419_v30 = vpop.f32.mrf.mxu1 }
 0x21b   :  { %v2377_v9 = vadd.f32 %v2376_v28, %v2334_v16 }
 0x21c   :  { %v2378_v33 = vpop.f32.mrf.mxu0  ;;  %v2421_v35 = vpop.f32.mrf.mxu1 }
 0x21d   :  { %v2379_v34 = vadd.f32 %v2378_v33, %v2336_v29  ;;  %v2420_v50 = vadd.f32 %v2419_v30, %v2377_v9 }
 0x21e   :  { %v2380_v36 = vpop.f32.mrf.mxu0  ;;  %v2423_v43 = vpop.f32.mrf.mxu1 }
 0x21f   :  { %v2381_v0 = vadd.f32 %v2380_v36, %v2338_v8  ;;  %v2422_v48 = vadd.f32 %v2421_v35, %v2379_v34  ;;  %v2600_v55 = vmax.f32 %v2420_v50, 0.0 }
 0x220   :  { %v2382_v47 = vpop.f32.mrf.mxu0  ;;  %v2425_v42 = vpop.f32.mrf.mxu1 }
 0x221   :  { %v2424_v40 = vadd.f32 %v2423_v43, %v2381_v0  ;;  %v2383_v49 = vadd.f32 %v2382_v47, %v2340_v38  ;;  %v2601_v54 = vmax.f32 %v2422_v48, 0.0  ;;  %v3286_v0 = vld [vmem:[%s4027_s6] ss:$0 sm:$0xff] }
 0x223   :  { %v2426_v52 = vadd.f32 %v2425_v42, %v2383_v49  ;;  %v2604_v41 = vmax.f32 %v2424_v40, 0.0 }
 0x225   :  { %v2605_v45 = vmax.f32 %v2426_v52, 0.0  ;;  %v2608_v44 = vpack.c.bf16 %v2604_v41, %v2600_v55 }
 0x227   :  { %v2609_v56 = vpack.c.bf16 %v2605_v45, %v2601_v54 }
 0x229   :  { %2907 = vmatprep.mubr.bf16.mxu0 %v2609_v56 }
 0x22a   :  { %2908 = vmatmul.mubr.bf16.vlgmr.msra.gmra.mxu0 %v2608_v44 }
 0x25a   :  { %v2462_v32 = vpop.f32.mrf.mxu0 }
 0x25b   :  { %v2505_v25 = vpop.f32.mrf.mxu1  ;;  %v2463_v2 = vadd.f32 %v2462_v32, %v967_v61 }
 0x25c   :  { %v2464_v58 = vpop.f32.mrf.mxu0 }
 0x25d   :  { %v2507_v59 = vpop.f32.mrf.mxu1  ;;  %v2465_v1 = vadd.f32 %v2464_v58, %v971_v60  ;;  %v2506_v20 = vadd.f32 %v2505_v25, %v2463_v2 }
 0x25e   :  { %v2466_v62 = vpop.f32.mrf.mxu0 }
 0x25f   :  { %v2509_v63 = vpop.f32.mrf.mxu1  ;;  %v2467_v4 = vadd.f32 %v2466_v62, %v967_v61  ;;  %v2508_v15 = vadd.f32 %v2507_v59, %v2465_v1 }
 0x260   :  { %v2468_v3 = vpop.f32.mrf.mxu0 }
 0x261   :  { %v2511_v5 = vpop.f32.mrf.mxu1  ;;  %v2469_v18 = vadd.f32 %v2468_v3, %v971_v60  ;;  %v2510_v6 = vadd.f32 %v2509_v63, %v2467_v4 }
 0x263   :  { %v2512_v7 = vadd.f32 %v2511_v5, %v2469_v18 }
 0x29a   :  { %v2548_v14 = vpop.f32.mrf.mxu0 }
 0x29b   :  { %v2591_v19 = vpop.f32.mrf.mxu1  ;;  %v2549_v10 = vadd.f32 %v2548_v14, %v2506_v20 }
 0x29c   :  { %v2550_v21 = vpop.f32.mrf.mxu0 }
 0x29d   :  { %v2551_v23 = vadd.f32 %v2550_v21, %v2508_v15  ;;  %v2593_v24 = vpop.f32.mrf.mxu1  ;;  %v2592_v29 = vadd.f32 %v2591_v19, %v2549_v10 }
 0x29e   :  { %v2552_v11 = vpop.f32.mrf.mxu0 }
 0x29f   :  { %v2553_v12 = vadd.f32 %v2552_v11, %v2510_v6  ;;  %v2595_v17 = vpop.f32.mrf.mxu1  ;;  %v2594_v27 = vadd.f32 %v2593_v24, %v2551_v23  ;;  %v2602_v8 = vmax.f32 %v2592_v29, 0.0 }
 0x2a0   :  { %v2554_v26 = vpop.f32.mrf.mxu0 }
 0x2a1   :  { %v2596_v28 = vadd.f32 %v2595_v17, %v2553_v12  ;;  %v2555_v13 = vadd.f32 %v2554_v26, %v2512_v7  ;;  %v2597_v22 = vpop.f32.mrf.mxu1  ;;  %v2603_v16 = vmax.f32 %v2594_v27, 0.0 }
 0x2a3   :  { %v2598_v30 = vadd.f32 %v2597_v22, %v2555_v13  ;;  %v2606_v31 = vmax.f32 %v2596_v28, 0.0 }
 0x2a5   :  { %v2607_v33 = vmax.f32 %v2598_v30, 0.0  ;;  %v2610_v35 = vpack.c.bf16 %v2606_v31, %v2602_v8 }
 0x2a7   :  { %v2611_v34 = vpack.c.bf16 %v2607_v33, %v2603_v16 }
 0x2a9   :  { %2948 = vmatprep.mubr.bf16.mxu1 %v2611_v34 }
 0x2aa   :  { %2949 = vmatmul.mubr.bf16.vlgmr.msra.gmra.mxu1 %v2610_v35 }
 0x2ea   :  { %v3335_v9 = vpop.f32.mrf.mxu0 }
 0x2ec   :  { %v3336_v36 = vpop.f32.mrf.mxu0 }
 0x2ed   :  { %v3337_v38 = vadd.f32 %v3336_v36, %v3335_v9 }
 0x2ee   :  { %v3338_v37 = vpop.f32.mrf.mxu0 }
 0x2ef   :  { %v2910_v48 = vadd.f32 %v3337_v38, %v3286_v0 }
 0x2f0   :  { %v3339_v43 = vpop.f32.mrf.mxu0 }
 0x2f1   :  { %v3340_v40 = vadd.f32 %v3339_v43, %v3338_v37 }
 0x2f3   :  { %v2913_v52 = vadd.f32 %v3340_v40, %v3286_v0 }
 0x36a   :  { %v3357_v46 = vpop.f32.mrf.mxu1 }
 0x36c   :  { %v3358_v47 = vpop.f32.mrf.mxu1 }
 0x36d   :  { %v3359_v49 = vadd.f32 %v3358_v47, %v3357_v46 }
 0x36e   :  { %v3360_v50 = vpop.f32.mrf.mxu1 }
 0x36f   :  { %v2951_v42 = vadd.f32 %v3359_v49, %v2910_v48 }
 0x370   :  { %v3361_v51 = vpop.f32.mrf.mxu1 }
 0x371   :  { %2957 = vst [vmem:[%s4028_s7] sm:$0xff] %v2951_v42  ;;  %v3362_v53 = vadd.f32 %v3361_v51, %v3360_v50 }
 0x373   :  { %v2954_v41 = vadd.f32 %v3362_v53, %v2913_v52 }
 0x375   :  { %2958 = vst [vmem:[%s4028_s7 + $0x8] sm:$0xff] %v2954_v41 }
 0x376   :  { %2963 = vsyncpa [#allocation3], 1 }
 0x377   :  { %2964 = vsyncpa [#allocation5], 1 }

</bundles_post_ra>
